<compile_context>
chip_gen: v7x
topology: tpu7x:2x2x1
jax: 0.10.0
libtpu: 0.0.40
codegen_flags: <defaults>
</compile_context>

<pallas_src>
import numpy as np
import jax
import jax.numpy as jnp
from jax.experimental import pallas as pl
from jax.experimental.pallas import tpu as pltpu


# ----------------------------- Butcher tableau ------------------------------

def dopri5_tableau():
    c = [0.0, 1 / 5, 3 / 10, 4 / 5, 8 / 9, 1.0, 1.0]
    a = [
        [],
        [1 / 5],
        [3 / 40, 9 / 40],
        [44 / 45, -56 / 15, 32 / 9],
        [19372 / 6561, -25360 / 2187, 64448 / 6561, -212 / 729],
        [9017 / 3168, -355 / 33, 46732 / 5247, 49 / 176, -5103 / 18656],
        [35 / 384, 0.0, 500 / 1113, 125 / 192, -2187 / 6784, 11 / 84],
    ]
    b = [35 / 384, 0.0, 500 / 1113, 125 / 192, -2187 / 6784, 11 / 84, 0.0]
    b_low = [5179 / 57600, 0.0, 7571 / 16695, 393 / 640, -92097 / 339200,
             187 / 2100, 1 / 40]
    n = len(c)
    a_full = np.array([row + [0.0] * (n - len(row)) for row in a],
                      dtype=np.float64)
    c = np.array(c, dtype=np.float64)
    b = np.array(b, dtype=np.float64)
    b_err = b - np.array(b_low, dtype=np.float64)
    return c, a_full, b, b_err


def tableau_flags(c, a, b):
    lower = np.all(np.triu(a, k=1) == 0.0)
    fsal = bool(lower and np.all(b == a[-1]) and c[0] == 0.0 and c[-1] == 1.0
                and a[0, 0] == 0.0)
    ssal = bool(lower and np.all(b == a[-1]) and c[-1] == 1.0
                and a[-1, -1] == 0.0)
    return fsal, ssal


# ------------------------------ Pallas kernel --------------------------------

def make_erk_kernel(c_np, a_np, b_np, berr_np, ssal):
    """Build the RK-step kernel with tableau coefficients baked in."""
    n_stages = a_np.shape[0]

    def _add(acc, coeff, k):
        """acc += coeff * k (f32), skipping structural zeros at trace time."""
        if coeff == 0.0:
            return acc
        term = jnp.float32(coeff) * k
        return term if acc is None else acc + term

    def kernel(y0_ref, f0_ref, td_ref, w_ref, u_ref, y1_ref, err_ref, k_ref):
        # ---- loads, promoted to f32 working precision ----
        y0 = y0_ref[...].astype(jnp.float32)       # (TB, F)
        f0 = f0_ref[...].astype(jnp.float32)       # (TB, F)  prev_vf1 / f(t0,y0)
        td = td_ref[...].astype(jnp.float32)       # (TB, 2)  [t0 | dt], f32
        t0_col = td[:, 0:1]                        # (TB, 1)
        dt_col = td[:, 1:2]                        # (TB, 1)  dt_data
        w = w_ref[...]                             # (F, F)   resident
        u = u_ref[...].astype(jnp.float32)         # (1, F)   resident

        # ---- hoisted broadcasts / algebraic rewrite of the forcing term ----
        dt_b = jnp.broadcast_to(dt_col, y0.shape)  # built once, reused
        t0u = t0_col * u                           # t0 * u   (TB, F)
        dtu = dt_col * u                           # dt * u   (TB, F)

        # ---- incremental accumulators: accs[i] = sum_{j<i} a[i,j] * k[j] ----
        accs = [None] * n_stages
        acc_err = None
        acc_b = None

        ks = [None] * n_stages
        ks[0] = f0
        k_ref[0] = f0.astype(k_ref.dtype)
        for m in range(1, n_stages):
            accs[m] = _add(accs[m], float(a_np[m, 0]), ks[0])
        acc_err = _add(acc_err, float(berr_np[0]), ks[0])
        if not ssal:
            acc_b = _add(acc_b, float(b_np[0]), ks[0])

        y_i = y0
        for i in range(1, n_stages):
            # y_i = y0 + dt * sum_{j<i} a[i, j] * k[j]   (accs[i] already built)
            acc_i = accs[i] if accs[i] is not None else jnp.zeros_like(y0)
            y_i = y0 + dt_b * acc_i
            # k[i] = f(t0 + c[i]*dt, y_i) = y_i @ W + t0*u + c[i]*(dt*u)
            forcing = t0u + jnp.float32(float(c_np[i])) * dtu
            ks[i] = (jnp.dot(y_i.astype(w.dtype), w,
                             preferred_element_type=jnp.float32) + forcing)
            k_ref[i] = ks[i].astype(k_ref.dtype)
            # scatter k_i into later stages + b/err accumulators (VPU work that
            # overlaps the next stage's MXU matmul)
            for m in range(i + 1, n_stages):
                accs[m] = _add(accs[m], float(a_np[m, i]), ks[i])
            acc_err = _add(acc_err, float(berr_np[i]), ks[i])
            if not ssal:
                acc_b = _add(acc_b, float(b_np[i]), ks[i])

        if ssal:
            y1 = y_i
        else:
            acc_b = acc_b if acc_b is not None else jnp.zeros_like(y0)
            y1 = y0 + dt_b * acc_b

        acc_err = acc_err if acc_err is not None else jnp.zeros_like(y0)
        err = dt_b * acc_err

        y1_ref[...] = y1.astype(y1_ref.dtype)
        err_ref[...] = err.astype(err_ref.dtype)   # err output is always f32

    return kernel


# ----------------------- VMEM budget & tile selection -------------------------

def _vmem_budget():
    """(budget_bytes for tile sizing, vmem_limit_bytes for CompilerParams)."""
    try:
        cap = int(pltpu.get_tpu_info().vmem_capacity_bytes)
    except Exception:
        cap = 64 << 20  # conservative: assume v7x-class 64 MiB physical VMEM
    # ~45% of physical for pipeline buffers + in-kernel f32 working set;
    # the rest is headroom for Mosaic internal scratch.
    budget = max(16 << 20, min(int(cap * 0.45), 96 << 20))
    limit = int(min(cap - (8 << 20), budget + (8 << 20)))
    return budget, limit


def _pick_batch_tile(B, F, n_stages, state_itemsize, k_itemsize,
                     const_bytes, budget_bytes, max_tile=1024, min_grid=4):
    """Largest batch tile (multiple of 8) within the VMEM budget that also
    keeps a few grid steps alive for pipelining / megacore sharding."""
    # BlockSpec HBM<->VMEM buffers (double-buffered): y0, f0, y1 (state dtype),
    # err (f32), n_stages * k, plus the tiny (TB,2) time block.
    io_per_row = 2 * (F * (3 * state_itemsize + 4 + n_stages * k_itemsize)
                      + 2 * 4)
    # In-kernel f32 live working set (~12 live (TB,F) arrays: partial stage
    # sums, acc_err, y0, f0, dt_b, t0u, dtu, y_i, current k, ...).
    live_per_row = 12 * F * 4
    per_row = io_per_row + live_per_row
    avail = max(budget_bytes - const_bytes, 8 * per_row)
    cap = max(8, min(max_tile, (avail // per_row) // 8 * 8))
    # Keep the grid at least `min_grid` deep when B allows it (DMA/compute
    # overlap; lets v7x's two TensorCores split the "parallel" axis).
    depth = min(min_grid, max(1, B // 8))
    cap = min(cap, max(8, (B // depth) // 8 * 8))
    for t in range(cap, 7, -8):
        if B % t == 0:
            return t
    return cap  # no multiple-of-8 divisor: caller pads B up to a multiple


# ------------------------------ step wrapper ----------------------------------

def erk_step(y0, t0, dt, prev_vf1, w, u, tableau, k_dtype=None):
    """One explicit Runge-Kutta step. Returns (y1, error_estimate(f32), k)."""
    c_np, a_np, b_np, berr_np = tableau
    fsal, ssal = tableau_flags(c_np, a_np, b_np)
    n_stages = a_np.shape[0]
    B, F = y0.shape
    out_dtype = y0.dtype
    k_dtype = jnp.dtype(out_dtype) if k_dtype is None else jnp.dtype(k_dtype)

    # t0 / dt kept in f32 regardless of state dtype; merged into one block.
    td = jnp.stack([t0.astype(jnp.float32), dt.astype(jnp.float32)], axis=1)

    if fsal and prev_vf1 is not None:
        f0 = prev_vf1
    else:
        # non-FSAL path: vf0 = term(t0, y0)  (same math as the in-kernel term)
        f0 = (jnp.dot(y0, w, preferred_element_type=jnp.float32)
              + t0.astype(jnp.float32)[:, None] * u).astype(out_dtype)
    f0 = f0.astype(out_dtype)

    state_itemsize = jnp.dtype(out_dtype).itemsize
    k_itemsize = k_dtype.itemsize
    const_bytes = (F * F * jnp.dtype(w.dtype).itemsize
                   + F * jnp.dtype(u.dtype).itemsize)

    budget, vmem_limit = _vmem_budget()
    TB = _pick_batch_tile(B, F, n_stages, state_itemsize, k_itemsize,
                          const_bytes, budget)

    # Pad batch up to a multiple of TB (zero rows are computed then sliced off).
    padB = (-B) % TB
    Bp = B + padB
    if padB:
        y0p = jnp.pad(y0, ((0, padB), (0, 0)))
        f0p = jnp.pad(f0, ((0, padB), (0, 0)))
        tdp = jnp.pad(td, ((0, padB), (0, 0)))
    else:
        y0p, f0p, tdp = y0, f0, td

    grid = (Bp // TB,)
    kernel = make_erk_kernel(c_np, a_np, b_np, berr_np, ssal)

    flops = 2 * (n_stages - 1) * Bp * F * F
    bytes_accessed = (Bp * F * (3 * state_itemsize + 4 + n_stages * k_itemsize)
                      + Bp * 2 * 4 + const_bytes)

    out_shape = (
        jax.ShapeDtypeStruct((Bp, F), out_dtype),          # y1
        jax.ShapeDtypeStruct((Bp, F), jnp.float32),        # err (always f32)
        jax.ShapeDtypeStruct((n_stages, Bp, F), k_dtype),  # k
    )

    def _call(single_buffer_consts):
        if single_buffer_consts:
            # Resident constants: constant index_map, single-buffered to free
            # F*F (+F) bytes of VMEM (matters for large F on v7x).
            w_spec = pl.BlockSpec((F, F), lambda i: (0, 0),
                                  pipeline_mode=pl.Buffered(1))
            u_spec = pl.BlockSpec((1, F), lambda i: (0, 0),
                                  pipeline_mode=pl.Buffered(1))
        else:
            w_spec = pl.BlockSpec((F, F), lambda i: (0, 0))
            u_spec = pl.BlockSpec((1, F), lambda i: (0, 0))
        fn = pl.pallas_call(
            kernel,
            out_shape=out_shape,
            grid=grid,
            in_specs=[
                pl.BlockSpec((TB, F), lambda i: (i, 0)),   # y0
                pl.BlockSpec((TB, F), lambda i: (i, 0)),   # f0 (prev_vf1)
                pl.BlockSpec((TB, 2), lambda i: (i, 0)),   # [t0 | dt] f32
                w_spec,                                    # W  (resident)
                u_spec,                                    # u  (resident)
            ],
            out_specs=(
                pl.BlockSpec((TB, F), lambda i: (i, 0)),               # y1
                pl.BlockSpec((TB, F), lambda i: (i, 0)),               # err
                pl.BlockSpec((n_stages, TB, F), lambda i: (0, i, 0)),  # k
            ),
            compiler_params=pltpu.CompilerParams(
                dimension_semantics=("parallel",),
                vmem_limit_bytes=int(vmem_limit)),
            cost_estimate=pl.CostEstimate(
                flops=int(flops), transcendentals=0,
                bytes_accessed=int(bytes_accessed)),
        )
        out = fn(y0p, f0p, tdp, w, u)
        jax.block_until_ready(out)
        return out

    try:
        y1p, errp, kp = _call(True)
    except Exception:
        # Pallas version without per-BlockSpec pipeline_mode / Buffered(1):
        # fall back to default double-buffered resident W / u.
        y1p, errp, kp = _call(False)

    y1 = y1p[:B]
    err = errp[:B]
    k = kp[:, :B, :]
    # FSAL: new state prev_vf1 = k[-1]; interpolation data = (t0, dt, y0, y1, k)
    return y1, err, k


# ------------------------------ reference (JAX) -------------------------------

def erk_step_ref(y0, t0, dt, prev_vf1, w, u, tableau):
    c_np, a_np, b_np, berr_np = tableau
    fsal, ssal = tableau_flags(c_np, a_np, b_np)
    n_stages = a_np.shape[0]
    t0c = t0.astype(jnp.float32)[:, None]
    dtc = dt.astype(jnp.float32)[:, None]

    def term(t_col, y):
        return jnp.dot(y, w, preferred_element_type=jnp.float32) + t_col * u

    vf0 = prev_vf1 if (fsal and prev_vf1 is not None) else term(t0c, y0)
    ks = [vf0.astype(jnp.float32)]
    y_i = y0.astype(jnp.float32)
    for i in range(1, n_stages):
        acc = sum(float(a_np[i, j]) * ks[j] for j in range(i)
                  if a_np[i, j] != 0.0)
        y_i = y0 + dtc * acc
        t_i = t0c + float(c_np[i]) * dtc
        ks.append(term(t_i, y_i))
    k = jnp.stack(ks, axis=0)
    if ssal:
        y1 = y_i
    else:
        y1 = y0 + dtc * sum(float(b_np[s]) * ks[s] for s in range(n_stages))
    err = dtc * sum(float(berr_np[s]) * ks[s] for s in range(n_stages))
    return y1, err, k


# ----------------------------------- main -------------------------------------

if __name__ == "__main__":
    B, F = 16, 128  # batch, features (lane-aligned)
    tableau = dopri5_tableau()

    key = jax.random.PRNGKey(0)
    k1, k2, k3, k4, k5 = jax.random.split(key, 5)
    y0 = jax.random.normal(k1, (B, F), dtype=jnp.float32)
    t0 = jax.random.uniform(k2, (B,), dtype=jnp.float32)
    dt = 0.05 + 0.05 * jax.random.uniform(k3, (B,), dtype=jnp.float32)
    w = 0.1 * jax.random.normal(k4, (F, F), dtype=jnp.float32)  # term weight
    u = 0.1 * jax.random.normal(k5, (1, F), dtype=jnp.float32)  # term bias(t)

    # FSAL init: prev_vf1 = term(t_start, y0)   (ERKState.prev_vf1)
    prev_vf1 = (jnp.dot(y0, w, preferred_element_type=jnp.float32)
                + t0[:, None] * u)

    y1, err, k = erk_step(y0, t0, dt, prev_vf1, w, u, tableau)
    jax.block_until_ready((y1, err, k))

    y1_r, err_r, k_r = erk_step_ref(y0, t0, dt, prev_vf1, w, u, tableau)
    assert jnp.allclose(y1, y1_r, rtol=1e-4, atol=1e-4)
    assert jnp.allclose(err, err_r, rtol=1e-4, atol=1e-4)
    assert jnp.allclose(k, k_r, rtol=1e-4, atol=1e-4)

    print("KERNEL_OK")
</pallas_src>

<mosaic_0001>
module attributes {stable_mosaic.version = 11 : i64} {
  func.func @kernel(%arg0: i32, %arg1: memref<8x128xf32, #tpu.memory_space<vmem>>, %arg2: memref<8x128xf32, #tpu.memory_space<vmem>>, %arg3: memref<8x2xf32, #tpu.memory_space<vmem>>, %arg4: memref<128x128xf32, #tpu.memory_space<vmem>>, %arg5: memref<1x128xf32, #tpu.memory_space<vmem>>, %arg6: memref<8x128xf32, #tpu.memory_space<vmem>>, %arg7: memref<8x128xf32, #tpu.memory_space<vmem>>, %arg8: memref<7x8x128xf32, #tpu.memory_space<vmem>>) attributes {dimension_semantics = [#tpu.dimension_semantics<parallel>], iteration_bounds = array<i64: 2>, scalar_prefetch = 0 : i64, scratch_operands = 0 : i64, tpu.core_type = #tpu.core_type<tc>, window_params = [{transform_indices = @transform_0, window_bounds = array<i64: 8, 128>}, {transform_indices = @transform_1, window_bounds = array<i64: 8, 128>}, {transform_indices = @transform_2, window_bounds = array<i64: 8, 2>}, {pipeline_mode = #tpu.pipeline_mode<synchronous>, transform_indices = @transform_3, window_bounds = array<i64: 128, 128>}, {pipeline_mode = #tpu.pipeline_mode<synchronous>, transform_indices = @transform_4, window_bounds = array<i64: 1, 128>}, {transform_indices = @transform_5, window_bounds = array<i64: 8, 128>}, {transform_indices = @transform_6, window_bounds = array<i64: 8, 128>}, {transform_indices = @transform_7, window_bounds = array<i64: 7, 8, 128>}]} {
    %c0 = arith.constant 0 : index
    %c0_0 = arith.constant 0 : index
    %0 = vector.load %arg1[%c0, %c0_0] : memref<8x128xf32, #tpu.memory_space<vmem>>, vector<8x128xf32>
    %c0_1 = arith.constant 0 : index
    %c0_2 = arith.constant 0 : index
    %1 = vector.load %arg2[%c0_1, %c0_2] : memref<8x128xf32, #tpu.memory_space<vmem>>, vector<8x128xf32>
    %c0_3 = arith.constant 0 : index
    %c0_4 = arith.constant 0 : index
    %2 = vector.load %arg3[%c0_3, %c0_4] : memref<8x2xf32, #tpu.memory_space<vmem>>, vector<8x2xf32>
    %3 = vector.extract_strided_slice %2 {offsets = [0, 0], sizes = [8, 1], strides = [1, 1]} : vector<8x2xf32> to vector<8x1xf32>
    %4 = vector.extract_strided_slice %2 {offsets = [0, 1], sizes = [8, 1], strides = [1, 1]} : vector<8x2xf32> to vector<8x1xf32>
    %c0_5 = arith.constant 0 : index
    %c0_6 = arith.constant 0 : index
    %5 = vector.load %arg4[%c0_5, %c0_6] : memref<128x128xf32, #tpu.memory_space<vmem>>, vector<128x128xf32>
    %c0_7 = arith.constant 0 : index
    %c0_8 = arith.constant 0 : index
    %6 = vector.load %arg5[%c0_7, %c0_8] : memref<1x128xf32, #tpu.memory_space<vmem>>, vector<1x128xf32>
    %7 = vector.shape_cast %4 : vector<8x1xf32> to vector<8x1xf32>
    %8 = vector.broadcast %7 : vector<8x1xf32> to vector<8x128xf32>
    %9 = vector.broadcast %3 : vector<8x1xf32> to vector<8x128xf32>
    %10 = vector.broadcast %6 : vector<1x128xf32> to vector<8x128xf32>
    %11 = arith.mulf %9, %10 : vector<8x128xf32>
    %12 = vector.broadcast %4 : vector<8x1xf32> to vector<8x128xf32>
    %13 = vector.broadcast %6 : vector<1x128xf32> to vector<8x128xf32>
    %14 = arith.mulf %12, %13 : vector<8x128xf32>
    %c0_9 = arith.constant 0 : index
    %c0_10 = arith.constant 0 : index
    %c0_11 = arith.constant 0 : index
    %15 = vector.load %arg8[%c0_9, %c0_10, %c0_11] : memref<7x8x128xf32, #tpu.memory_space<vmem>>, vector<1x8x128xf32>
    %16 = vector.shape_cast %15 : vector<1x8x128xf32> to vector<8x128xf32>
    %17 = vector.shape_cast %1 : vector<8x128xf32> to vector<1x8x128xf32>
    tpu.vector_store %arg8[%c0_9, %c0_10, %c0_11], %17 {strides = array<i32>} : memref<7x8x128xf32, #tpu.memory_space<vmem>>, vector<1x8x128xf32>,
    %cst = arith.constant 2.000000e-01 : f32
    %18 = vector.broadcast %cst : f32 to vector<8x128xf32>
    %19 = arith.mulf %18, %1 : vector<8x128xf32>
    %cst_12 = arith.constant 7.500000e-02 : f32
    %20 = vector.broadcast %cst_12 : f32 to vector<8x128xf32>
    %21 = arith.mulf %20, %1 : vector<8x128xf32>
    %cst_13 = arith.constant 0.977777779 : f32
    %22 = vector.broadcast %cst_13 : f32 to vector<8x128xf32>
    %23 = arith.mulf %22, %1 : vector<8x128xf32>
    %cst_14 = arith.constant 2.95259857 : f32
    %24 = vector.broadcast %cst_14 : f32 to vector<8x128xf32>
    %25 = arith.mulf %24, %1 : vector<8x128xf32>
    %cst_15 = arith.constant 2.84627533 : f32
    %26 = vector.broadcast %cst_15 : f32 to vector<8x128xf32>
    %27 = arith.mulf %26, %1 : vector<8x128xf32>
    %cst_16 = arith.constant 0.0911458358 : f32
    %28 = vector.broadcast %cst_16 : f32 to vector<8x128xf32>
    %29 = arith.mulf %28, %1 : vector<8x128xf32>
    %cst_17 = arith.constant 0.00123263884 : f32
    %30 = vector.broadcast %cst_17 : f32 to vector<8x128xf32>
    %31 = arith.mulf %30, %1 : vector<8x128xf32>
    %32 = arith.mulf %8, %19 : vector<8x128xf32>
    %33 = arith.addf %0, %32 : vector<8x128xf32>
    %cst_18 = arith.constant 2.000000e-01 : f32
    %34 = vector.broadcast %cst_18 : f32 to vector<8x128xf32>
    %35 = arith.mulf %34, %14 : vector<8x128xf32>
    %36 = arith.addf %11, %35 : vector<8x128xf32>
    %cst_19 = arith.constant dense<0.000000e+00> : vector<8x128xf32>
    %37 = tpu.matmul %33, %5, %cst_19 {dimension_numbers = #tpu.dot_dimension_numbers<[1], [0], [0], [1], [0, 0, 1, 1], [], []>} : vector<8x128xf32>, vector<128x128xf32>, vector<8x128xf32> -> vector<8x128xf32>
    %38 = arith.addf %37, %36 : vector<8x128xf32>
    %c1 = arith.constant 1 : index
    %c0_20 = arith.constant 0 : index
    %c0_21 = arith.constant 0 : index
    %39 = vector.load %arg8[%c1, %c0_20, %c0_21] : memref<7x8x128xf32, #tpu.memory_space<vmem>>, vector<1x8x128xf32>
    %40 = vector.shape_cast %39 : vector<1x8x128xf32> to vector<8x128xf32>
    %41 = vector.shape_cast %38 : vector<8x128xf32> to vector<1x8x128xf32>
    tpu.vector_store %arg8[%c1, %c0_20, %c0_21], %41 {strides = array<i32>} : memref<7x8x128xf32, #tpu.memory_space<vmem>>, vector<1x8x128xf32>,
    %cst_22 = arith.constant 2.250000e-01 : f32
    %42 = vector.broadcast %cst_22 : f32 to vector<8x128xf32>
    %43 = arith.mulf %42, %38 : vector<8x128xf32>
    %44 = arith.addf %21, %43 : vector<8x128xf32>
    %cst_23 = arith.constant -3.73333335 : f32
    %45 = vector.broadcast %cst_23 : f32 to vector<8x128xf32>
    %46 = arith.mulf %45, %38 : vector<8x128xf32>
    %47 = arith.addf %23, %46 : vector<8x128xf32>
    %cst_24 = arith.constant -11.5957937 : f32
    %48 = vector.broadcast %cst_24 : f32 to vector<8x128xf32>
    %49 = arith.mulf %48, %38 : vector<8x128xf32>
    %50 = arith.addf %25, %49 : vector<8x128xf32>
    %cst_25 = arith.constant -10.757576 : f32
    %51 = vector.broadcast %cst_25 : f32 to vector<8x128xf32>
    %52 = arith.mulf %51, %38 : vector<8x128xf32>
    %53 = arith.addf %27, %52 : vector<8x128xf32>
    %54 = arith.mulf %8, %44 : vector<8x128xf32>
    %55 = arith.addf %0, %54 : vector<8x128xf32>
    %cst_26 = arith.constant 3.000000e-01 : f32
    %56 = vector.broadcast %cst_26 : f32 to vector<8x128xf32>
    %57 = arith.mulf %56, %14 : vector<8x128xf32>
    %58 = arith.addf %11, %57 : vector<8x128xf32>
    %cst_27 = arith.constant dense<0.000000e+00> : vector<8x128xf32>
    %59 = tpu.matmul %55, %5, %cst_27 {dimension_numbers = #tpu.dot_dimension_numbers<[1], [0], [0], [1], [0, 0, 1, 1], [], []>} : vector<8x128xf32>, vector<128x128xf32>, vector<8x128xf32> -> vector<8x128xf32>
    %60 = arith.addf %59, %58 : vector<8x128xf32>
    %c2 = arith.constant 2 : index
    %c0_28 = arith.constant 0 : index
    %c0_29 = arith.constant 0 : index
    %61 = vector.load %arg8[%c2, %c0_28, %c0_29] : memref<7x8x128xf32, #tpu.memory_space<vmem>>, vector<1x8x128xf32>
    %62 = vector.shape_cast %61 : vector<1x8x128xf32> to vector<8x128xf32>
    %63 = vector.shape_cast %60 : vector<8x128xf32> to vector<1x8x128xf32>
    tpu.vector_store %arg8[%c2, %c0_28, %c0_29], %63 {strides = array<i32>} : memref<7x8x128xf32, #tpu.memory_space<vmem>>, vector<1x8x128xf32>,
    %cst_30 = arith.constant 3.55555558 : f32
    %64 = vector.broadcast %cst_30 : f32 to vector<8x128xf32>
    %65 = arith.mulf %64, %60 : vector<8x128xf32>
    %66 = arith.addf %47, %65 : vector<8x128xf32>
    %cst_31 = arith.constant 9.82289314 : f32
    %67 = vector.broadcast %cst_31 : f32 to vector<8x128xf32>
    %68 = arith.mulf %67, %60 : vector<8x128xf32>
    %69 = arith.addf %50, %68 : vector<8x128xf32>
    %cst_32 = arith.constant 8.90642261 : f32
    %70 = vector.broadcast %cst_32 : f32 to vector<8x128xf32>
    %71 = arith.mulf %70, %60 : vector<8x128xf32>
    %72 = arith.addf %53, %71 : vector<8x128xf32>
    %cst_33 = arith.constant 0.449236304 : f32
    %73 = vector.broadcast %cst_33 : f32 to vector<8x128xf32>
    %74 = arith.mulf %73, %60 : vector<8x128xf32>
    %75 = arith.addf %29, %74 : vector<8x128xf32>
    %cst_34 = arith.constant -0.00425277045 : f32
    %76 = vector.broadcast %cst_34 : f32 to vector<8x128xf32>
    %77 = arith.mulf %76, %60 : vector<8x128xf32>
    %78 = arith.addf %31, %77 : vector<8x128xf32>
    %79 = arith.mulf %8, %66 : vector<8x128xf32>
    %80 = arith.addf %0, %79 : vector<8x128xf32>
    %cst_35 = arith.constant 8.000000e-01 : f32
    %81 = vector.broadcast %cst_35 : f32 to vector<8x128xf32>
    %82 = arith.mulf %81, %14 : vector<8x128xf32>
    %83 = arith.addf %11, %82 : vector<8x128xf32>
    %cst_36 = arith.constant dense<0.000000e+00> : vector<8x128xf32>
    %84 = tpu.matmul %80, %5, %cst_36 {dimension_numbers = #tpu.dot_dimension_numbers<[1], [0], [0], [1], [0, 0, 1, 1], [], []>} : vector<8x128xf32>, vector<128x128xf32>, vector<8x128xf32> -> vector<8x128xf32>
    %85 = arith.addf %84, %83 : vector<8x128xf32>
    %c3 = arith.constant 3 : index
    %c0_37 = arith.constant 0 : index
    %c0_38 = arith.constant 0 : index
    %86 = vector.load %arg8[%c3, %c0_37, %c0_38] : memref<7x8x128xf32, #tpu.memory_space<vmem>>, vector<1x8x128xf32>
    %87 = vector.shape_cast %86 : vector<1x8x128xf32> to vector<8x128xf32>
    %88 = vector.shape_cast %85 : vector<8x128xf32> to vector<1x8x128xf32>
    tpu.vector_store %arg8[%c3, %c0_37, %c0_38], %88 {strides = array<i32>} : memref<7x8x128xf32, #tpu.memory_space<vmem>>, vector<1x8x128xf32>,
    %cst_39 = arith.constant -0.290809333 : f32
    %89 = vector.broadcast %cst_39 : f32 to vector<8x128xf32>
    %90 = arith.mulf %89, %85 : vector<8x128xf32>
    %91 = arith.addf %69, %90 : vector<8x128xf32>
    %cst_40 = arith.constant 0.278409094 : f32
    %92 = vector.broadcast %cst_40 : f32 to vector<8x128xf32>
    %93 = arith.mulf %92, %85 : vector<8x128xf32>
    %94 = arith.addf %72, %93 : vector<8x128xf32>
    %cst_41 = arith.constant 0.651041686 : f32
    %95 = vector.broadcast %cst_41 : f32 to vector<8x128xf32>
    %96 = arith.mulf %95, %85 : vector<8x128xf32>
    %97 = arith.addf %75, %96 : vector<8x128xf32>
    %cst_42 = arith.constant 0.0369791649 : f32
    %98 = vector.broadcast %cst_42 : f32 to vector<8x128xf32>
    %99 = arith.mulf %98, %85 : vector<8x128xf32>
    %100 = arith.addf %78, %99 : vector<8x128xf32>
    %101 = arith.mulf %8, %91 : vector<8x128xf32>
    %102 = arith.addf %0, %101 : vector<8x128xf32>
    %cst_43 = arith.constant 0.888888895 : f32
    %103 = vector.broadcast %cst_43 : f32 to vector<8x128xf32>
    %104 = arith.mulf %103, %14 : vector<8x128xf32>
    %105 = arith.addf %11, %104 : vector<8x128xf32>
    %cst_44 = arith.constant dense<0.000000e+00> : vector<8x128xf32>
    %106 = tpu.matmul %102, %5, %cst_44 {dimension_numbers = #tpu.dot_dimension_numbers<[1], [0], [0], [1], [0, 0, 1, 1], [], []>} : vector<8x128xf32>, vector<128x128xf32>, vector<8x128xf32> -> vector<8x128xf32>
    %107 = arith.addf %106, %105 : vector<8x128xf32>
    %c4 = arith.constant 4 : index
    %c0_45 = arith.constant 0 : index
    %c0_46 = arith.constant 0 : index
    %108 = vector.load %arg8[%c4, %c0_45, %c0_46] : memref<7x8x128xf32, #tpu.memory_space<vmem>>, vector<1x8x128xf32>
    %109 = vector.shape_cast %108 : vector<1x8x128xf32> to vector<8x128xf32>
    %110 = vector.shape_cast %107 : vector<8x128xf32> to vector<1x8x128xf32>
    tpu.vector_store %arg8[%c4, %c0_45, %c0_46], %110 {strides = array<i32>} : memref<7x8x128xf32, #tpu.memory_space<vmem>>, vector<1x8x128xf32>,
    %cst_47 = arith.constant -0.273531318 : f32
    %111 = vector.broadcast %cst_47 : f32 to vector<8x128xf32>
    %112 = arith.mulf %111, %107 : vector<8x128xf32>
    %113 = arith.addf %94, %112 : vector<8x128xf32>
    %cst_48 = arith.constant -0.322376192 : f32
    %114 = vector.broadcast %cst_48 : f32 to vector<8x128xf32>
    %115 = arith.mulf %114, %107 : vector<8x128xf32>
    %116 = arith.addf %97, %115 : vector<8x128xf32>
    %cst_49 = arith.constant -5.086380e-02 : f32
    %117 = vector.broadcast %cst_49 : f32 to vector<8x128xf32>
    %118 = arith.mulf %117, %107 : vector<8x128xf32>
    %119 = arith.addf %100, %118 : vector<8x128xf32>
    %120 = arith.mulf %8, %113 : vector<8x128xf32>
    %121 = arith.addf %0, %120 : vector<8x128xf32>
    %cst_50 = arith.constant 1.000000e+00 : f32
    %122 = vector.broadcast %cst_50 : f32 to vector<8x128xf32>
    %123 = arith.mulf %122, %14 : vector<8x128xf32>
    %124 = arith.addf %11, %123 : vector<8x128xf32>
    %cst_51 = arith.constant dense<0.000000e+00> : vector<8x128xf32>
    %125 = tpu.matmul %121, %5, %cst_51 {dimension_numbers = #tpu.dot_dimension_numbers<[1], [0], [0], [1], [0, 0, 1, 1], [], []>} : vector<8x128xf32>, vector<128x128xf32>, vector<8x128xf32> -> vector<8x128xf32>
    %126 = arith.addf %125, %124 : vector<8x128xf32>
    %c5 = arith.constant 5 : index
    %c0_52 = arith.constant 0 : index
    %c0_53 = arith.constant 0 : index
    %127 = vector.load %arg8[%c5, %c0_52, %c0_53] : memref<7x8x128xf32, #tpu.memory_space<vmem>>, vector<1x8x128xf32>
    %128 = vector.shape_cast %127 : vector<1x8x128xf32> to vector<8x128xf32>
    %129 = vector.shape_cast %126 : vector<8x128xf32> to vector<1x8x128xf32>
    tpu.vector_store %arg8[%c5, %c0_52, %c0_53], %129 {strides = array<i32>} : memref<7x8x128xf32, #tpu.memory_space<vmem>>, vector<1x8x128xf32>,
    %cst_54 = arith.constant 0.130952388 : f32
    %130 = vector.broadcast %cst_54 : f32 to vector<8x128xf32>
    %131 = arith.mulf %130, %126 : vector<8x128xf32>
    %132 = arith.addf %116, %131 : vector<8x128xf32>
    %cst_55 = arith.constant 0.0419047624 : f32
    %133 = vector.broadcast %cst_55 : f32 to vector<8x128xf32>
    %134 = arith.mulf %133, %126 : vector<8x128xf32>
    %135 = arith.addf %119, %134 : vector<8x128xf32>
    %136 = arith.mulf %8, %132 : vector<8x128xf32>
    %137 = arith.addf %0, %136 : vector<8x128xf32>
    %cst_56 = arith.constant 1.000000e+00 : f32
    %138 = vector.broadcast %cst_56 : f32 to vector<8x128xf32>
    %139 = arith.mulf %138, %14 : vector<8x128xf32>
    %140 = arith.addf %11, %139 : vector<8x128xf32>
    %cst_57 = arith.constant dense<0.000000e+00> : vector<8x128xf32>
    %141 = tpu.matmul %137, %5, %cst_57 {dimension_numbers = #tpu.dot_dimension_numbers<[1], [0], [0], [1], [0, 0, 1, 1], [], []>} : vector<8x128xf32>, vector<128x128xf32>, vector<8x128xf32> -> vector<8x128xf32>
    %142 = arith.addf %141, %140 : vector<8x128xf32>
    %c6 = arith.constant 6 : index
    %c0_58 = arith.constant 0 : index
    %c0_59 = arith.constant 0 : index
    %143 = vector.load %arg8[%c6, %c0_58, %c0_59] : memref<7x8x128xf32, #tpu.memory_space<vmem>>, vector<1x8x128xf32>
    %144 = vector.shape_cast %143 : vector<1x8x128xf32> to vector<8x128xf32>
    %145 = vector.shape_cast %142 : vector<8x128xf32> to vector<1x8x128xf32>
    tpu.vector_store %arg8[%c6, %c0_58, %c0_59], %145 {strides = array<i32>} : memref<7x8x128xf32, #tpu.memory_space<vmem>>, vector<1x8x128xf32>,
    %cst_60 = arith.constant -2.500000e-02 : f32
    %146 = vector.broadcast %cst_60 : f32 to vector<8x128xf32>
    %147 = arith.mulf %146, %142 : vector<8x128xf32>
    %148 = arith.addf %135, %147 : vector<8x128xf32>
    %149 = arith.mulf %8, %148 : vector<8x128xf32>
    %c0_61 = arith.constant 0 : index
    %c0_62 = arith.constant 0 : index
    %150 = vector.load %arg6[%c0_61, %c0_62] : memref<8x128xf32, #tpu.memory_space<vmem>>, vector<8x128xf32>
    tpu.vector_store %arg6[%c0_61, %c0_62], %137 {strides = array<i32>} : memref<8x128xf32, #tpu.memory_space<vmem>>, vector<8x128xf32>,
    %c0_63 = arith.constant 0 : index
    %c0_64 = arith.constant 0 : index
    %151 = vector.load %arg7[%c0_63, %c0_64] : memref<8x128xf32, #tpu.memory_space<vmem>>, vector<8x128xf32>
    tpu.vector_store %arg7[%c0_63, %c0_64], %149 {strides = array<i32>} : memref<8x128xf32, #tpu.memory_space<vmem>>, vector<8x128xf32>,
    return
  }
  func.func @transform_0(%arg0: i32) -> (i32, i32) {
    %c0_i32 = arith.constant 0 : i32
    %c0_i32_0 = arith.constant 0 : i32
    return %arg0, %c0_i32 : i32, i32
  }
  func.func @transform_1(%arg0: i32) -> (i32, i32) {
    %c0_i32 = arith.constant 0 : i32
    %c0_i32_0 = arith.constant 0 : i32
    return %arg0, %c0_i32 : i32, i32
  }
  func.func @transform_2(%arg0: i32) -> (i32, i32) {
    %c0_i32 = arith.constant 0 : i32
    %c0_i32_0 = arith.constant 0 : i32
    return %arg0, %c0_i32 : i32, i32
  }
  func.func @transform_3(%arg0: i32) -> (i32, i32) {
    %c0_i32 = arith.constant 0 : i32
    %c0_i32_0 = arith.constant 0 : i32
    %c0_i32_1 = arith.constant 0 : i32
    return %c0_i32, %c0_i32_0 : i32, i32
  }
  func.func @transform_4(%arg0: i32) -> (i32, i32) {
    %c0_i32 = arith.constant 0 : i32
    %c0_i32_0 = arith.constant 0 : i32
    %c0_i32_1 = arith.constant 0 : i32
    return %c0_i32, %c0_i32_0 : i32, i32
  }
  func.func @transform_5(%arg0: i32) -> (i32, i32) {
    %c0_i32 = arith.constant 0 : i32
    %c0_i32_0 = arith.constant 0 : i32
    return %arg0, %c0_i32 : i32, i32
  }
  func.func @transform_6(%arg0: i32) -> (i32, i32) {
    %c0_i32 = arith.constant 0 : i32
    %c0_i32_0 = arith.constant 0 : i32
    return %arg0, %c0_i32 : i32, i32
  }
  func.func @transform_7(%arg0: i32) -> (i32, i32, i32) {
    %c0_i32 = arith.constant 0 : i32
    %c0_i32_0 = arith.constant 0 : i32
    %c0_i32_1 = arith.constant 0 : i32
    return %c0_i32, %arg0, %c0_i32_0 : i32, i32, i32
  }
}

module attributes {stable_mosaic.version = 11 : i64} {
  func.func @kernel(%arg0: i32, %arg1: memref<8x128xf32, #tpu.memory_space<vmem>>, %arg2: memref<8x128xf32, #tpu.memory_space<vmem>>, %arg3: memref<8x2xf32, #tpu.memory_space<vmem>>, %arg4: memref<128x128xf32, #tpu.memory_space<vmem>>, %arg5: memref<1x128xf32, #tpu.memory_space<vmem>>, %arg6: memref<8x128xf32, #tpu.memory_space<vmem>>, %arg7: memref<8x128xf32, #tpu.memory_space<vmem>>, %arg8: memref<7x8x128xf32, #tpu.memory_space<vmem>>) attributes {dimension_semantics = [#tpu.dimension_semantics<parallel>], iteration_bounds = array<i64: 2>, scalar_prefetch = 0 : i64, scratch_operands = 0 : i64, tpu.core_type = #tpu.core_type<tc>, window_params = [{transform_indices = @transform_0, window_bounds = array<i64: 8, 128>}, {transform_indices = @transform_1, window_bounds = array<i64: 8, 128>}, {transform_indices = @transform_2, window_bounds = array<i64: 8, 2>}, {pipeline_mode = #tpu.pipeline_mode<synchronous>, transform_indices = @transform_3, window_bounds = array<i64: 128, 128>}, {pipeline_mode = #tpu.pipeline_mode<synchronous>, transform_indices = @transform_4, window_bounds = array<i64: 1, 128>}, {transform_indices = @transform_5, window_bounds = array<i64: 8, 128>}, {transform_indices = @transform_6, window_bounds = array<i64: 8, 128>}, {transform_indices = @transform_7, window_bounds = array<i64: 7, 8, 128>}]} {
    %c0 = arith.constant 0 : index
    %c0_0 = arith.constant 0 : index
    %0 = vector.load %arg1[%c0, %c0_0] : memref<8x128xf32, #tpu.memory_space<vmem>>, vector<8x128xf32>
    %c0_1 = arith.constant 0 : index
    %c0_2 = arith.constant 0 : index
    %1 = vector.load %arg2[%c0_1, %c0_2] : memref<8x128xf32, #tpu.memory_space<vmem>>, vector<8x128xf32>
    %c0_3 = arith.constant 0 : index
    %c0_4 = arith.constant 0 : index
    %2 = vector.load %arg3[%c0_3, %c0_4] : memref<8x2xf32, #tpu.memory_space<vmem>>, vector<8x2xf32>
    %3 = vector.extract_strided_slice %2 {offsets = [0, 0], sizes = [8, 1], strides = [1, 1]} : vector<8x2xf32> to vector<8x1xf32>
    %4 = vector.extract_strided_slice %2 {offsets = [0, 1], sizes = [8, 1], strides = [1, 1]} : vector<8x2xf32> to vector<8x1xf32>
    %c0_5 = arith.constant 0 : index
    %c0_6 = arith.constant 0 : index
    %5 = vector.load %arg4[%c0_5, %c0_6] : memref<128x128xf32, #tpu.memory_space<vmem>>, vector<128x128xf32>
    %c0_7 = arith.constant 0 : index
    %c0_8 = arith.constant 0 : index
    %6 = vector.load %arg5[%c0_7, %c0_8] : memref<1x128xf32, #tpu.memory_space<vmem>>, vector<1x128xf32>
    %7 = vector.shape_cast %4 : vector<8x1xf32> to vector<8x1xf32>
    %8 = vector.broadcast %7 : vector<8x1xf32> to vector<8x128xf32>
    %9 = vector.broadcast %3 : vector<8x1xf32> to vector<8x128xf32>
    %10 = vector.broadcast %6 : vector<1x128xf32> to vector<8x128xf32>
    %11 = arith.mulf %9, %10 : vector<8x128xf32>
    %12 = vector.broadcast %4 : vector<8x1xf32> to vector<8x128xf32>
    %13 = vector.broadcast %6 : vector<1x128xf32> to vector<8x128xf32>
    %14 = arith.mulf %12, %13 : vector<8x128xf32>
    %c0_9 = arith.constant 0 : index
    %c0_10 = arith.constant 0 : index
    %c0_11 = arith.constant 0 : index
    %15 = vector.load %arg8[%c0_9, %c0_10, %c0_11] : memref<7x8x128xf32, #tpu.memory_space<vmem>>, vector<1x8x128xf32>
    %16 = vector.shape_cast %15 : vector<1x8x128xf32> to vector<8x128xf32>
    %17 = vector.shape_cast %1 : vector<8x128xf32> to vector<1x8x128xf32>
    tpu.vector_store %arg8[%c0_9, %c0_10, %c0_11], %17 {strides = array<i32>} : memref<7x8x128xf32, #tpu.memory_space<vmem>>, vector<1x8x128xf32>,
    %cst = arith.constant 2.000000e-01 : f32
    %18 = vector.broadcast %cst : f32 to vector<8x128xf32>
    %19 = arith.mulf %18, %1 : vector<8x128xf32>
    %cst_12 = arith.constant 7.500000e-02 : f32
    %20 = vector.broadcast %cst_12 : f32 to vector<8x128xf32>
    %21 = arith.mulf %20, %1 : vector<8x128xf32>
    %cst_13 = arith.constant 0.977777779 : f32
    %22 = vector.broadcast %cst_13 : f32 to vector<8x128xf32>
    %23 = arith.mulf %22, %1 : vector<8x128xf32>
    %cst_14 = arith.constant 2.95259857 : f32
    %24 = vector.broadcast %cst_14 : f32 to vector<8x128xf32>
    %25 = arith.mulf %24, %1 : vector<8x128xf32>
    %cst_15 = arith.constant 2.84627533 : f32
    %26 = vector.broadcast %cst_15 : f32 to vector<8x128xf32>
    %27 = arith.mulf %26, %1 : vector<8x128xf32>
    %cst_16 = arith.constant 0.0911458358 : f32
    %28 = vector.broadcast %cst_16 : f32 to vector<8x128xf32>
    %29 = arith.mulf %28, %1 : vector<8x128xf32>
    %cst_17 = arith.constant 0.00123263884 : f32
    %30 = vector.broadcast %cst_17 : f32 to vector<8x128xf32>
    %31 = arith.mulf %30, %1 : vector<8x128xf32>
    %32 = arith.mulf %8, %19 : vector<8x128xf32>
    %33 = arith.addf %0, %32 : vector<8x128xf32>
    %cst_18 = arith.constant 2.000000e-01 : f32
    %34 = vector.broadcast %cst_18 : f32 to vector<8x128xf32>
    %35 = arith.mulf %34, %14 : vector<8x128xf32>
    %36 = arith.addf %11, %35 : vector<8x128xf32>
    %cst_19 = arith.constant dense<0.000000e+00> : vector<8x128xf32>
    %37 = tpu.matmul %33, %5, %cst_19 {dimension_numbers = #tpu.dot_dimension_numbers<[1], [0], [0], [1], [0, 0, 1, 1], [], []>} : vector<8x128xf32>, vector<128x128xf32>, vector<8x128xf32> -> vector<8x128xf32>
    %38 = arith.addf %37, %36 : vector<8x128xf32>
    %c1 = arith.constant 1 : index
    %c0_20 = arith.constant 0 : index
    %c0_21 = arith.constant 0 : index
    %39 = vector.load %arg8[%c1, %c0_20, %c0_21] : memref<7x8x128xf32, #tpu.memory_space<vmem>>, vector<1x8x128xf32>
    %40 = vector.shape_cast %39 : vector<1x8x128xf32> to vector<8x128xf32>
    %41 = vector.shape_cast %38 : vector<8x128xf32> to vector<1x8x128xf32>
    tpu.vector_store %arg8[%c1, %c0_20, %c0_21], %41 {strides = array<i32>} : memref<7x8x128xf32, #tpu.memory_space<vmem>>, vector<1x8x128xf32>,
    %cst_22 = arith.constant 2.250000e-01 : f32
    %42 = vector.broadcast %cst_22 : f32 to vector<8x128xf32>
    %43 = arith.mulf %42, %38 : vector<8x128xf32>
    %44 = arith.addf %21, %43 : vector<8x128xf32>
    %cst_23 = arith.constant -3.73333335 : f32
    %45 = vector.broadcast %cst_23 : f32 to vector<8x128xf32>
    %46 = arith.mulf %45, %38 : vector<8x128xf32>
    %47 = arith.addf %23, %46 : vector<8x128xf32>
    %cst_24 = arith.constant -11.5957937 : f32
    %48 = vector.broadcast %cst_24 : f32 to vector<8x128xf32>
    %49 = arith.mulf %48, %38 : vector<8x128xf32>
    %50 = arith.addf %25, %49 : vector<8x128xf32>
    %cst_25 = arith.constant -10.757576 : f32
    %51 = vector.broadcast %cst_25 : f32 to vector<8x128xf32>
    %52 = arith.mulf %51, %38 : vector<8x128xf32>
    %53 = arith.addf %27, %52 : vector<8x128xf32>
    %54 = arith.mulf %8, %44 : vector<8x128xf32>
    %55 = arith.addf %0, %54 : vector<8x128xf32>
    %cst_26 = arith.constant 3.000000e-01 : f32
    %56 = vector.broadcast %cst_26 : f32 to vector<8x128xf32>
    %57 = arith.mulf %56, %14 : vector<8x128xf32>
    %58 = arith.addf %11, %57 : vector<8x128xf32>
    %cst_27 = arith.constant dense<0.000000e+00> : vector<8x128xf32>
    %59 = tpu.matmul %55, %5, %cst_27 {dimension_numbers = #tpu.dot_dimension_numbers<[1], [0], [0], [1], [0, 0, 1, 1], [], []>} : vector<8x128xf32>, vector<128x128xf32>, vector<8x128xf32> -> vector<8x128xf32>
    %60 = arith.addf %59, %58 : vector<8x128xf32>
    %c2 = arith.constant 2 : index
    %c0_28 = arith.constant 0 : index
    %c0_29 = arith.constant 0 : index
    %61 = vector.load %arg8[%c2, %c0_28, %c0_29] : memref<7x8x128xf32, #tpu.memory_space<vmem>>, vector<1x8x128xf32>
    %62 = vector.shape_cast %61 : vector<1x8x128xf32> to vector<8x128xf32>
    %63 = vector.shape_cast %60 : vector<8x128xf32> to vector<1x8x128xf32>
    tpu.vector_store %arg8[%c2, %c0_28, %c0_29], %63 {strides = array<i32>} : memref<7x8x128xf32, #tpu.memory_space<vmem>>, vector<1x8x128xf32>,
    %cst_30 = arith.constant 3.55555558 : f32
    %64 = vector.broadcast %cst_30 : f32 to vector<8x128xf32>
    %65 = arith.mulf %64, %60 : vector<8x128xf32>
    %66 = arith.addf %47, %65 : vector<8x128xf32>
    %cst_31 = arith.constant 9.82289314 : f32
    %67 = vector.broadcast %cst_31 : f32 to vector<8x128xf32>
    %68 = arith.mulf %67, %60 : vector<8x128xf32>
    %69 = arith.addf %50, %68 : vector<8x128xf32>
    %cst_32 = arith.constant 8.90642261 : f32
    %70 = vector.broadcast %cst_32 : f32 to vector<8x128xf32>
    %71 = arith.mulf %70, %60 : vector<8x128xf32>
    %72 = arith.addf %53, %71 : vector<8x128xf32>
    %cst_33 = arith.constant 0.449236304 : f32
    %73 = vector.broadcast %cst_33 : f32 to vector<8x128xf32>
    %74 = arith.mulf %73, %60 : vector<8x128xf32>
    %75 = arith.addf %29, %74 : vector<8x128xf32>
    %cst_34 = arith.constant -0.00425277045 : f32
    %76 = vector.broadcast %cst_34 : f32 to vector<8x128xf32>
    %77 = arith.mulf %76, %60 : vector<8x128xf32>
    %78 = arith.addf %31, %77 : vector<8x128xf32>
    %79 = arith.mulf %8, %66 : vector<8x128xf32>
    %80 = arith.addf %0, %79 : vector<8x128xf32>
    %cst_35 = arith.constant 8.000000e-01 : f32
    %81 = vector.broadcast %cst_35 : f32 to vector<8x128xf32>
    %82 = arith.mulf %81, %14 : vector<8x128xf32>
    %83 = arith.addf %11, %82 : vector<8x128xf32>
    %cst_36 = arith.constant dense<0.000000e+00> : vector<8x128xf32>
    %84 = tpu.matmul %80, %5, %cst_36 {dimension_numbers = #tpu.dot_dimension_numbers<[1], [0], [0], [1], [0, 0, 1, 1], [], []>} : vector<8x128xf32>, vector<128x128xf32>, vector<8x128xf32> -> vector<8x128xf32>
    %85 = arith.addf %84, %83 : vector<8x128xf32>
    %c3 = arith.constant 3 : index
    %c0_37 = arith.constant 0 : index
    %c0_38 = arith.constant 0 : index
    %86 = vector.load %arg8[%c3, %c0_37, %c0_38] : memref<7x8x128xf32, #tpu.memory_space<vmem>>, vector<1x8x128xf32>
    %87 = vector.shape_cast %86 : vector<1x8x128xf32> to vector<8x128xf32>
    %88 = vector.shape_cast %85 : vector<8x128xf32> to vector<1x8x128xf32>
    tpu.vector_store %arg8[%c3, %c0_37, %c0_38], %88 {strides = array<i32>} : memref<7x8x128xf32, #tpu.memory_space<vmem>>, vector<1x8x128xf32>,
    %cst_39 = arith.constant -0.290809333 : f32
    %89 = vector.broadcast %cst_39 : f32 to vector<8x128xf32>
    %90 = arith.mulf %89, %85 : vector<8x128xf32>
    %91 = arith.addf %69, %90 : vector<8x128xf32>
    %cst_40 = arith.constant 0.278409094 : f32
    %92 = vector.broadcast %cst_40 : f32 to vector<8x128xf32>
    %93 = arith.mulf %92, %85 : vector<8x128xf32>
    %94 = arith.addf %72, %93 : vector<8x128xf32>
    %cst_41 = arith.constant 0.651041686 : f32
    %95 = vector.broadcast %cst_41 : f32 to vector<8x128xf32>
    %96 = arith.mulf %95, %85 : vector<8x128xf32>
    %97 = arith.addf %75, %96 : vector<8x128xf32>
    %cst_42 = arith.constant 0.0369791649 : f32
    %98 = vector.broadcast %cst_42 : f32 to vector<8x128xf32>
    %99 = arith.mulf %98, %85 : vector<8x128xf32>
    %100 = arith.addf %78, %99 : vector<8x128xf32>
    %101 = arith.mulf %8, %91 : vector<8x128xf32>
    %102 = arith.addf %0, %101 : vector<8x128xf32>
    %cst_43 = arith.constant 0.888888895 : f32
    %103 = vector.broadcast %cst_43 : f32 to vector<8x128xf32>
    %104 = arith.mulf %103, %14 : vector<8x128xf32>
    %105 = arith.addf %11, %104 : vector<8x128xf32>
    %cst_44 = arith.constant dense<0.000000e+00> : vector<8x128xf32>
    %106 = tpu.matmul %102, %5, %cst_44 {dimension_numbers = #tpu.dot_dimension_numbers<[1], [0], [0], [1], [0, 0, 1, 1], [], []>} : vector<8x128xf32>, vector<128x128xf32>, vector<8x128xf32> -> vector<8x128xf32>
    %107 = arith.addf %106, %105 : vector<8x128xf32>
    %c4 = arith.constant 4 : index
    %c0_45 = arith.constant 0 : index
    %c0_46 = arith.constant 0 : index
    %108 = vector.load %arg8[%c4, %c0_45, %c0_46] : memref<7x8x128xf32, #tpu.memory_space<vmem>>, vector<1x8x128xf32>
    %109 = vector.shape_cast %108 : vector<1x8x128xf32> to vector<8x128xf32>
    %110 = vector.shape_cast %107 : vector<8x128xf32> to vector<1x8x128xf32>
    tpu.vector_store %arg8[%c4, %c0_45, %c0_46], %110 {strides = array<i32>} : memref<7x8x128xf32, #tpu.memory_space<vmem>>, vector<1x8x128xf32>,
    %cst_47 = arith.constant -0.273531318 : f32
    %111 = vector.broadcast %cst_47 : f32 to vector<8x128xf32>
    %112 = arith.mulf %111, %107 : vector<8x128xf32>
    %113 = arith.addf %94, %112 : vector<8x128xf32>
    %cst_48 = arith.constant -0.322376192 : f32
    %114 = vector.broadcast %cst_48 : f32 to vector<8x128xf32>
    %115 = arith.mulf %114, %107 : vector<8x128xf32>
    %116 = arith.addf %97, %115 : vector<8x128xf32>
    %cst_49 = arith.constant -5.086380e-02 : f32
    %117 = vector.broadcast %cst_49 : f32 to vector<8x128xf32>
    %118 = arith.mulf %117, %107 : vector<8x128xf32>
    %119 = arith.addf %100, %118 : vector<8x128xf32>
    %120 = arith.mulf %8, %113 : vector<8x128xf32>
    %121 = arith.addf %0, %120 : vector<8x128xf32>
    %cst_50 = arith.constant 1.000000e+00 : f32
    %122 = vector.broadcast %cst_50 : f32 to vector<8x128xf32>
    %123 = arith.mulf %122, %14 : vector<8x128xf32>
    %124 = arith.addf %11, %123 : vector<8x128xf32>
    %cst_51 = arith.constant dense<0.000000e+00> : vector<8x128xf32>
    %125 = tpu.matmul %121, %5, %cst_51 {dimension_numbers = #tpu.dot_dimension_numbers<[1], [0], [0], [1], [0, 0, 1, 1], [], []>} : vector<8x128xf32>, vector<128x128xf32>, vector<8x128xf32> -> vector<8x128xf32>
    %126 = arith.addf %125, %124 : vector<8x128xf32>
    %c5 = arith.constant 5 : index
    %c0_52 = arith.constant 0 : index
    %c0_53 = arith.constant 0 : index
    %127 = vector.load %arg8[%c5, %c0_52, %c0_53] : memref<7x8x128xf32, #tpu.memory_space<vmem>>, vector<1x8x128xf32>
    %128 = vector.shape_cast %127 : vector<1x8x128xf32> to vector<8x128xf32>
    %129 = vector.shape_cast %126 : vector<8x128xf32> to vector<1x8x128xf32>
    tpu.vector_store %arg8[%c5, %c0_52, %c0_53], %129 {strides = array<i32>} : memref<7x8x128xf32, #tpu.memory_space<vmem>>, vector<1x8x128xf32>,
    %cst_54 = arith.constant 0.130952388 : f32
    %130 = vector.broadcast %cst_54 : f32 to vector<8x128xf32>
    %131 = arith.mulf %130, %126 : vector<8x128xf32>
    %132 = arith.addf %116, %131 : vector<8x128xf32>
    %cst_55 = arith.constant 0.0419047624 : f32
    %133 = vector.broadcast %cst_55 : f32 to vector<8x128xf32>
    %134 = arith.mulf %133, %126 : vector<8x128xf32>
    %135 = arith.addf %119, %134 : vector<8x128xf32>
    %136 = arith.mulf %8, %132 : vector<8x128xf32>
    %137 = arith.addf %0, %136 : vector<8x128xf32>
    %cst_56 = arith.constant 1.000000e+00 : f32
    %138 = vector.broadcast %cst_56 : f32 to vector<8x128xf32>
    %139 = arith.mulf %138, %14 : vector<8x128xf32>
    %140 = arith.addf %11, %139 : vector<8x128xf32>
    %cst_57 = arith.constant dense<0.000000e+00> : vector<8x128xf32>
    %141 = tpu.matmul %137, %5, %cst_57 {dimension_numbers = #tpu.dot_dimension_numbers<[1], [0], [0], [1], [0, 0, 1, 1], [], []>} : vector<8x128xf32>, vector<128x128xf32>, vector<8x128xf32> -> vector<8x128xf32>
    %142 = arith.addf %141, %140 : vector<8x128xf32>
    %c6 = arith.constant 6 : index
    %c0_58 = arith.constant 0 : index
    %c0_59 = arith.constant 0 : index
    %143 = vector.load %arg8[%c6, %c0_58, %c0_59] : memref<7x8x128xf32, #tpu.memory_space<vmem>>, vector<1x8x128xf32>
    %144 = vector.shape_cast %143 : vector<1x8x128xf32> to vector<8x128xf32>
    %145 = vector.shape_cast %142 : vector<8x128xf32> to vector<1x8x128xf32>
    tpu.vector_store %arg8[%c6, %c0_58, %c0_59], %145 {strides = array<i32>} : memref<7x8x128xf32, #tpu.memory_space<vmem>>, vector<1x8x128xf32>,
    %cst_60 = arith.constant -2.500000e-02 : f32
    %146 = vector.broadcast %cst_60 : f32 to vector<8x128xf32>
    %147 = arith.mulf %146, %142 : vector<8x128xf32>
    %148 = arith.addf %135, %147 : vector<8x128xf32>
    %149 = arith.mulf %8, %148 : vector<8x128xf32>
    %c0_61 = arith.constant 0 : index
    %c0_62 = arith.constant 0 : index
    %150 = vector.load %arg6[%c0_61, %c0_62] : memref<8x128xf32, #tpu.memory_space<vmem>>, vector<8x128xf32>
    tpu.vector_store %arg6[%c0_61, %c0_62], %137 {strides = array<i32>} : memref<8x128xf32, #tpu.memory_space<vmem>>, vector<8x128xf32>,
    %c0_63 = arith.constant 0 : index
    %c0_64 = arith.constant 0 : index
    %151 = vector.load %arg7[%c0_63, %c0_64] : memref<8x128xf32, #tpu.memory_space<vmem>>, vector<8x128xf32>
    tpu.vector_store %arg7[%c0_63, %c0_64], %149 {strides = array<i32>} : memref<8x128xf32, #tpu.memory_space<vmem>>, vector<8x128xf32>,
    return
  }
  func.func @transform_0(%arg0: i32) -> (i32, i32) {
    %c0_i32 = arith.constant 0 : i32
    %c0_i32_0 = arith.constant 0 : i32
    return %arg0, %c0_i32 : i32, i32
  }
  func.func @transform_1(%arg0: i32) -> (i32, i32) {
    %c0_i32 = arith.constant 0 : i32
    %c0_i32_0 = arith.constant 0 : i32
    return %arg0, %c0_i32 : i32, i32
  }
  func.func @transform_2(%arg0: i32) -> (i32, i32) {
    %c0_i32 = arith.constant 0 : i32
    %c0_i32_0 = arith.constant 0 : i32
    return %arg0, %c0_i32 : i32, i32
  }
  func.func @transform_3(%arg0: i32) -> (i32, i32) {
    %c0_i32 = arith.constant 0 : i32
    %c0_i32_0 = arith.constant 0 : i32
    %c0_i32_1 = arith.constant 0 : i32
    return %c0_i32, %c0_i32_0 : i32, i32
  }
  func.func @transform_4(%arg0: i32) -> (i32, i32) {
    %c0_i32 = arith.constant 0 : i32
    %c0_i32_0 = arith.constant 0 : i32
    %c0_i32_1 = arith.constant 0 : i32
    return %c0_i32, %c0_i32_0 : i32, i32
  }
  func.func @transform_5(%arg0: i32) -> (i32, i32) {
    %c0_i32 = arith.constant 0 : i32
    %c0_i32_0 = arith.constant 0 : i32
    return %arg0, %c0_i32 : i32, i32
  }
  func.func @transform_6(%arg0: i32) -> (i32, i32) {
    %c0_i32 = arith.constant 0 : i32
    %c0_i32_0 = arith.constant 0 : i32
    return %arg0, %c0_i32 : i32, i32
  }
  func.func @transform_7(%arg0: i32) -> (i32, i32, i32) {
    %c0_i32 = arith.constant 0 : i32
    %c0_i32_0 = arith.constant 0 : i32
    %c0_i32_1 = arith.constant 0 : i32
    return %c0_i32, %arg0, %c0_i32_0 : i32, i32, i32
  }
}

</mosaic_0001>

<bundles_post_ra>
// kernel: tpu_custom_call.1
= control target key start
LH: loop header
LB: loop body
LE: loop exit
PB: predicated region body
PF: predicated region fallthrough
CT: control target
= control target key end

     0   :  { %13 = vsyncpa [#allocation3], 0  ;;  %s2383_s0 = inlined_call_operand.vmem [shape: f32[16,128], index: 0, kind: input, shape index: {}]   ;;  %s2384_s1 = inlined_call_operand.hbm [shape: f32[16,128], index: 1, kind: input, shape index: {}]   ;;  %s2385_s2 = inlined_call_operand.vmem [shape: f32[16,2], index: 2, kind: input, shape index: {}]   ;;  %s2386_s3 = inlined_call_operand.hbm [shape: f32[128,128], index: 3, kind: input, shape index: {}]   ;;  %s2387_s4 = inlined_call_operand.vmem [shape: f32[1,128], index: 4, kind: input, shape index: {}]   ;;  %s2388_s5 = inlined_call_operand.hbm [shape: f32[16,128], index: 5, kind: output, shape index: {0}]   ;;  %s2389_s6 = inlined_call_operand.hbm [shape: f32[16,128], index: 6, kind: output, shape index: {1}]   ;;  %s2390_s7 = inlined_call_operand.hbm [shape: f32[7,16,128], index: 7, kind: output, shape index: {2}]  }
   0x1   :  { %15 = vsyncpa [#allocation3 + $0x1], 0 }
   0x2   :  { %16 = vsyncpa [#allocation6], 0 }
   0x3   :  { %17 = vsyncpa [#allocation4], 0 }
   0x4   :  { %19 = vsyncpa [#allocation4 + $0x1], 0 }
   0x5   :  { %20 = vsyncpa [#allocation9], 0 }
   0x6   :  { %22 = vsyncpa [#allocation9 + $0x1], 0  ;;  %s1925_s24 = smov 0   ;;  %s1927_s25 = smov 0  }
   0x7   :  { %s1929_s26 = smov 0   ;;  %s1931_s27 = smov 0  }
   0x8 LB: > { %s1946_s28 = sadd.s32 4294967295, %s1868_s27   ;;  %s2394_s29 = sadd.s32 4294967294, %s1868_s27   ;;  %s1868_s27 = sphi %s1931_s27, %s2412_s27   ;;  %s1864_s26 = sphi %s1929_s26, %s2411_s26   ;;  %s1860_s25 = sphi %s1927_s25, %s2410_s25   ;;  %s1856_s24 = sphi %s1925_s24, %s2409_s24  }
   0x9   : > { %p74_p0 = scmp.ne.s32.totalorder %s1860_s25, %s1856_s24  ;;  %p2391_p1 = scmp.eq.s32.totalorder %s1946_s28, 0 }
   0xa   : > { %p172_p3 = scmp.eq.s32.totalorder %s2394_s29, 1  ;;  %p1118_p5 = scmp.ge.s32.totalorder %s1868_s27, 1 }
   0xb   : > { %p1957_p4 = por %p2391_p1, %p74_p0  ;;  %p231_p7 = scmp.lt.s32.totalorder %s1868_s27, 3 }
   0xc   : > { %p1962_p6 = por %p172_p3, %p74_p0  ;;  %s1870_s10 = smov [#allocation5]  }
   0xd   : > { %s2395_s30 = scalar_select %p1957_p4, 1, 0 }
   0xe   : > { %s2396_s8 = scalar_select %p1962_p6, 1, 0 }
   0xf   : > { %p1967_p8 = pnand %p1118_p5, %p231_p7  ;;  %s243_s11 = sshll.u32 %s1870_s10, 4  ;;  %s1971_s11 = int_to_ptr.vmem [resolvable:$true] %s243_s11 }
  0x10   : > { %s1983_s13 = sadd.s32 1, %s1868_s27   ;;  %s61_s14 = sadd.s32 1, %s1864_s26 }
  0x11   : > { %s2397_s9 = scalar_select %p1967_p8, 1, 0 }
  0x12   : > { %p1613_p9 = pneg %p1967_p8  ;;  %s58_s15 = ssub.s32 %s1868_s27, %s1983_s13 }
  0x13   : > { %s1680_s18 = scalar_lea.hbm %s2386_s3, 2048 }
  0x14   : > { %p1978_p11 = pnand %p1613_p9, %p2391_p1  ;;  %p1681_p12 = scmp.ne.s32.totalorder %s2386_s3, %s1680_s18 }
  0x15   : > { %p1687_p5 = scmp.lt.u32.totalorder %s1680_s18, %s2386_s3 }
  0x16   : > { %p1682_p13 = pneg %p1978_p11 }
  0x18   : > { %p1683_p0 = pnand %p1682_p13, %p1681_p12 }
  0x1a   : > { %p1684_p3 = pneg %p1683_p0 }
  0x1c   : > { %p1689_p7 = pnand %p1687_p5, %p1684_p3 }
  0x1e   : > { %1692 = shalt.err (!%p1689_p7)
}
  0x1f   : > { %s1693_s23 = scalar_lea.vmem %s1971_s11, 2048  ;;  %p1701_p2 = scmp.lt.s32.totalorder %s1971_s11, %s1971_s11 }
  0x20   : > { %p1694_p9 = scmp.ne.s32.totalorder %s1971_s11, %s1693_s23  ;;  %p1702_p6 = scmp.lt.s32.totalorder %s1693_s23, %s1693_s23 }
  0x22   : > { %p1696_p10 = pnand %p1694_p9, %p1682_p13  ;;  %p1703_p4 = por %p1702_p6, %p1701_p2 }
  0x24   : > { %p1697_p1 = pneg %p1696_p10 }
  0x26   : > { %p1704_p8 = pnand %p1703_p4, %p1697_p1 }
  0x28   : > { %1707 = shalt.err (!%p1704_p8)
}
  0x29   : > { %s1871_s10 = smov 128   ;;  %s1872_s16 = smov 8  }
  0x2a   : > { %1616 = dma.hbm_to_vmem [thread:$0]  (!%p1978_p11), %s2386_s3, 2048, %s1971_s11, [#allocation6], %s1871_s10, %s1871_s10, %s1872_s16  }
  0x2b   : > { %p59_p2 = scmp.eq.s32.totalorder %s58_s15, 0  ;;  %p68_p1 = scmp.ne.s32.totalorder %s1864_s26, %s1860_s25 }
  0x2c   : > { %p69_p4 = scmp.eq.s32.totalorder %s1868_s27, 0  ;;  %p1632_p6 = scmp.lt.s32.totalorder %s1868_s27, 2 }
  0x2d   : > { %s2014_s19 = scalar_select %p59_p2, %s1864_s26, %s61_s14  }
  0x2e   : > { %p70_p8 = por %p69_p4, %p68_p1  ;;  %p2399_p10 = scmp.eq.s32.totalorder %s1946_s28, 1 }
  0x2f   : > { %s267_s21 = sand.u32 1, %s1864_s26   ;;  %s1122_s22 = sshll.u32 %s1868_s27, 7 }
  0x30   : > { %p2018_p12 = por %p2399_p10, %p68_p1  ;;  %s1121_s23 = sshll.u32 %s267_s21, 3 }
  0x31   : > { %s2027_s17 = scalar_lea.hbm %s2384_s1, %s1122_s22  ;;  %s271_s11 = scalar_lea.vmem [#allocation2], %s1121_s23 }
  0x32   : > { %s278_s14 = sshll.u32 %s271_s11, 4  ;;  %p2029_p11 = pnand %p1632_p6, %p70_p8  ;;  %s2033_s14 = int_to_ptr.vmem [resolvable:$true] %s278_s14 }
  0x33   : > { %s268_s10 = scalar_lea.sflag [#allocation3], %s267_s21  ;;  %s1708_s16 = scalar_lea.hbm %s2027_s17, 128 }
  0x34   : > { %p1709_p13 = scmp.ne.s32.totalorder %s2027_s17, %s1708_s16  ;;  %p1710_p0 = pneg %p2029_p11 }
  0x35   : > { %s1713_s22 = scalar_lea.hbm %s2384_s1, 256  ;;  %p1714_p7 = scmp.lt.u32.totalorder %s2027_s17, %s2384_s1 }
  0x36   : > { %p1711_p3 = pnand %p1710_p0, %p1709_p13  ;;  %p1715_p9 = scmp.lt.u32.totalorder %s1713_s22, %s1708_s16 }
  0x37   : > { %p1717_p1 = scmp.lt.u32.totalorder %s1708_s16, %s2027_s17 }
  0x38   : > { %p1712_p5 = pneg %p1711_p3  ;;  %p1716_p2 = por %p1715_p9, %p1714_p7 }
  0x3a   : > { %p1718_p4 = por %p1717_p1, %p1716_p2 }
  0x3c   : > { %p1719_p6 = pnand %p1718_p4, %p1712_p5 }
  0x3e   : > { %1722 = shalt.err (!%p1719_p6)
}
  0x3f   : > { %s1723_s21 = scalar_lea.vmem %s2033_s14, 128  ;;  %s1873_s11 = smov [#allocation2]  }
  0x40   : > { %p1724_p8 = scmp.ne.s32.totalorder %s2033_s14, %s1723_s21  ;;  %s1728_s29 = sshll.u32 %s1873_s11, 4  ;;  %s1729_s29 = int_to_ptr.vmem [resolvable:$false] %s1728_s29 }
  0x41   : > { %s1730_s18 = scalar_lea.vmem %s1729_s29, 256  ;;  %p1731_p3 = scmp.lt.s32.totalorder %s2033_s14, %s1729_s29 }
  0x42   : > { %p1726_p10 = pnand %p1724_p8, %p1710_p0  ;;  %p1732_p7 = scmp.lt.s32.totalorder %s1730_s18, %s1723_s21 }
  0x44   : > { %p1727_p13 = pneg %p1726_p10  ;;  %p1733_p9 = por %p1732_p7, %p1731_p3 }
  0x46   : > { %p1734_p2 = pnand %p1733_p9, %p1727_p13 }
  0x48   : > { %1737 = shalt.err (!%p1734_p2)
}
  0x49   : > { %1620 = dma.hbm_to_vmem [thread:$0]  (!%p2029_p11), %s2027_s17, 128, %s2033_s14, %s268_s10  }
  0x4a   : > { %p2402_p5 = scmp.ne.s32.totalorder %s2397_s9, 0 }
  0x4b   : > { %s2063_s16 = sand.u32 (!%p2402_p5), 1, %s1860_s25   ;;  %p2403_p0 = scmp.ne.s32.totalorder (!%p2402_p5), %s2395_s30, 0 }
  0x4c   : > { %294 = sbr.rel (%p2402_p5) target bundleno = 1596 (0x63c), region = 40  ;;  %s2066_s22 = sshll.u32 (!%p2402_p5), %s2063_s16, 3 }
  0x4d   : > { %s297_s23 = scalar_lea.sflag (!%p2402_p5), [#allocation3], %s2063_s16  ;;  %s300_s12 = scalar_lea.vmem (!%p2402_p5), [#allocation2], %s2066_s22 }
  0x53   : > { %1839 = dma.done.wait (%p2403_p0), %s297_s23, 128  }
  0x54   : > { %1841 = vsyncadd (%p2403_p0), %s297_s23, 4294967168  ;;  %p2404_p11 = scmp.eq.s32.totalorder %s1946_s28, 0 }
  0x56   : > { %1843 = dma.done.wait (%p2404_p11), [#allocation6], 2048   ;;  %p2405_p1 = pmov %p2404_p11 }
  0x57   : > { %p353_p4 = scmp.lt.s32.totalorder %s1946_s28, 1  ;;  %v1874_v0 = vmov 1   ;;  %v1875_v1 = vmov 0.0|0.0   ;;  %v364_v3 = vld [vmem:[#allocation5] sm:$0xff]  ;;  %v365_v4 = vld [vmem:[#allocation5 + $0x8] sm:$0xff]  ;;  %v366_v5 = vld [vmem:[#allocation5 + $0x10] sm:$0xff] }
  0x58   : > { %1845 = vsyncadd (%p2405_p1), [#allocation6], 4294965248  ;;  %1678 = vset.pattern.permute.xlu0 %v1874_v0  ;;  %1456 = vmatprep.subr.bf16.mxu0 %v1875_v1  ;;  %v367_v6 = vld [vmem:[#allocation5 + $0x18] sm:$0xff]  ;;  %vm1876_vm0 = vmmov 0   ;;  %v1877_v7 = vmov 0.0   ;;  %v2092_v8 = vpack.c.bf16 %v365_v4, %v364_v3  ;;  %v1878_v10 = vmov 0  }
  0x59   : > { %s2081_s9 = scalar_select %p353_p4, %s1946_s28, 1  ;;  %1480 = vmatprep.subr.bf16.mxu1 %v1875_v1  ;;  %1278 = vmatprep.mubr.msk.f32.mxu0 %vm1876_vm0, %v1877_v7  ;;  %v2097_v9 = vpack.c.bf16 %v367_v6, %v366_v5  ;;  %v368_v11 = vld [vmem:[#allocation5 + $0x20] sm:$0xff]  ;;  %v369_v12 = vld [vmem:[#allocation5 + $0x28] sm:$0xff]  ;;  %v2108_v14 = vld [vmem:[%s300_s12] sm:$0xff] }
  0x5a   : > { %1313 = vmatprep.mubr.msk.f32.mxu1 %vm1876_vm0, %v1877_v7  ;;  %1458 = vmatpush3.bf16.msra.mxu0 %v2092_v8  ;;  %s1600_s10 = smul.u32 56, %s2063_s16  ;;  %v2104_v13 = vpack.c.bf16 %v369_v12, %v368_v11  ;;  %v370_v15 = vld [vmem:[#allocation5 + $0x30] sm:$0xff]  ;;  %v371_v16 = vld [vmem:[#allocation5 + $0x38] sm:$0xff]  ;;  %v372_v18 = vld [vmem:[#allocation5 + $0x40] sm:$0xff]  ;;  %v399_v30 = vmul.f32 0.2, %v2108_v14 }
  0x5b   : > { %s1128_s30 = sshll.u32 %s2081_s9, 3  ;;  %1482 = vmatpush3.bf16.msra.mxu1 %v2092_v8  ;;  %1459 = vmatprep.subr.bf16.mxu0 %v1875_v1  ;;  %v2118_v17 = vpack.c.bf16 %v371_v16, %v370_v15  ;;  %v373_v19 = vld [vmem:[#allocation5 + $0x48] sm:$0xff]  ;;  %v374_v21 = vld [vmem:[#allocation5 + $0x50] sm:$0xff]  ;;  %v375_v22 = vld [vmem:[#allocation5 + $0x58] sm:$0xff]  ;;  %v400_v51 = vmul.f32 0.075, %v2108_v14 }
  0x5c   : > { %s360_s15 = scalar_lea.vmem %s2385_s2, %s1128_s30  ;;  %1483 = vmatprep.subr.bf16.mxu1 %v1875_v1  ;;  %s2113_s21 = scalar_lea.vmem [#allocation10], %s1600_s10  ;;  %v2124_v20 = vpack.c.bf16 %v373_v19, %v372_v18  ;;  %v2130_v23 = vpack.c.bf16 %v375_v22, %v374_v21  ;;  %v376_v24 = vld [vmem:[#allocation5 + $0x60] sm:$0xff]  ;;  %v377_v25 = vld [vmem:[#allocation5 + $0x68] sm:$0xff]  ;;  %v378_v27 = vld [vmem:[#allocation5 + $0x70] sm:$0xff]  ;;  %v402_v56 = vmul.f32 2.9525986, %v2108_v14 }
  0x5d   : > { %v363_v2 = vld [vmem:[%s360_s15] sm:$0xff]  ;;  %398 = vst [vmem:[%s2113_s21] sm:$0xff] %v2108_v14  ;;  %v2136_v26 = vpack.c.bf16 %v377_v25, %v376_v24  ;;  %v379_v28 = vld [vmem:[#allocation5 + $0x78] sm:$0xff]  ;;  %s356_s18 = scalar_lea.vmem %s2383_s0, %s1128_s30  ;;  %v403_v57 = vmul.f32 2.8462753, %v2108_v14  ;;  %v401_v61 = vmul.f32 0.9777778, %v2108_v14 }
  0x5e   : > { %383 = vperm.xlu0 %1678, %v363_v2   ;;  %1461 = vmatpush3.bf16.msra.mxu0 %v2097_v9  ;;  %v2142_v29 = vpack.c.bf16 %v379_v28, %v378_v27  ;;  %v1130_v31 = vld [vmem:[%s2387_s4] ss:$0 sm:$0xff]  ;;  %v404_v19 = vmul.f32 0.091145836, %v2108_v14  ;;  %v405_v24 = vmul.f32 0.0012326388, %v2108_v14 }
  0x5f   : > { %1485 = vmatpush3.bf16.msra.mxu1 %v2097_v9  ;;  %1462 = vmatprep.subr.bf16.mxu0 %v1875_v1  ;;  %v2160_v32 = vld [vmem:[%s356_s18] sm:$0xff]  ;;  %s338_s9 = scalar_lea.vmem [#allocation7], %s2066_s22  ;;  %s2269_s30 = sshll.u32 %s1946_s28, 7 }
  0x60   : > { %1486 = vmatprep.subr.bf16.mxu1 %v1875_v1  ;;  %s2275_s15 = scalar_lea.hbm %s2388_s5, %s2269_s30  ;;  %s924_s10 = sshll.u32 %s338_s9, 4  ;;  %s925_s10 = int_to_ptr.vmem [resolvable:$true] %s924_s10 }
  0x61   : > { %s901_s11 = scalar_lea.sflag [#allocation4], %s2063_s16  ;;  %s1738_s29 = scalar_lea.vmem %s925_s10, 128 }
  0x62   : > { %1679 = vset.pattern.permute.xlu0 %v1878_v10  ;;  %1464 = vmatpush3.bf16.msra.mxu0 %v2104_v13  ;;  %p1739_p6 = scmp.ne.s32.totalorder %s925_s10, %s1738_s29  ;;  %s1879_s18 = smov [#allocation7]  }
  0x63   : > { %387 = vperm.xlu0 %1679, %v363_v2   ;;  %1488 = vmatpush3.bf16.msra.mxu1 %v2104_v13  ;;  %s1742_s23 = sshll.u32 %s1879_s18, 4  ;;  %s1743_s23 = int_to_ptr.vmem [resolvable:$false] %s1742_s23 }
  0x64   : > { %1465 = vmatprep.subr.bf16.mxu0 %v1875_v1  ;;  %1489 = vmatprep.subr.bf16.mxu1 %v1875_v1  ;;  %p1740_p8 = pnand %p1739_p6, %p2018_p12  ;;  %s1744_s12 = scalar_lea.vmem %s1743_s23, 256 }
  0x65   : > { %p1745_p13 = scmp.lt.s32.totalorder %s925_s10, %s1743_s23  ;;  %p1746_p3 = scmp.lt.s32.totalorder %s1744_s12, %s1738_s29 }
  0x66   : > { %1467 = vmatpush3.bf16.msra.mxu0 %v2118_v17  ;;  %p1741_p10 = pneg %p1740_p8 }
  0x67   : > { %1491 = vmatpush3.bf16.msra.mxu1 %v2118_v17  ;;  %1468 = vmatprep.subr.bf16.mxu0 %v1875_v1  ;;  %p1747_p7 = por %p1746_p3, %p1745_p13 }
  0x68   : > { %1492 = vmatprep.subr.bf16.mxu1 %v1875_v1 }
  0x69   : > { %p1748_p9 = pnand %p1747_p7, %p1741_p10 }
  0x6a   : > { %1470 = vmatpush3.bf16.msra.mxu0 %v2124_v20 }
  0x6b   : > { %1494 = vmatpush3.bf16.msra.mxu1 %v2124_v20  ;;  %1471 = vmatprep.subr.bf16.mxu0 %v1875_v1 }
  0x6c   : > { %1495 = vmatprep.subr.bf16.mxu1 %v1875_v1 }
  0x6e   : > { %1473 = vmatpush3.bf16.msra.mxu0 %v2130_v23 }
  0x6f   : > { %1497 = vmatpush3.bf16.msra.mxu1 %v2130_v23  ;;  %1474 = vmatprep.subr.bf16.mxu0 %v1875_v1 }
  0x70   : > { %1498 = vmatprep.subr.bf16.mxu1 %v1875_v1 }
  0x72   : > { %1476 = vmatpush3.bf16.msra.mxu0 %v2136_v26 }
  0x73   : > { %1500 = vmatpush3.bf16.msra.mxu1 %v2136_v26  ;;  %1477 = vmatprep.subr.bf16.mxu0 %v1875_v1 }
  0x74   : > { %1501 = vmatprep.subr.bf16.mxu1 %v1875_v1 }
  0x76   : > { %1479 = vmatpush3.bf16.msra.mxu0 %v2142_v29 }
  0x77   : > { %1503 = vmatpush3.bf16.msra.mxu1 %v2142_v29  ;;  %1504 = vmatprep.subr.bf16.mxu0 %v1875_v1 }
  0x78   : > { %1528 = vmatprep.subr.bf16.mxu1 %v1875_v1 }
  0xdd   : > { %v2162_v33 = vpop.permute.xlu0 %383 }
  0xde   : > { %v406_v34 = vmul.f32 %v399_v30, %v2162_v33  ;;  %v397_v35 = vmul.f32 %v1130_v31, %v2162_v33 }
  0xe0   : > { %v407_v36 = vadd.f32 %v406_v34, %v2160_v32  ;;  %v492_v39 = vmul.f32 0.3, %v397_v35  ;;  %v578_v40 = vmul.f32 0.8, %v397_v35  ;;  %v662_v41 = vmul.f32 0.8888889, %v397_v35 }
  0xe1   : > { %v408_v46 = vmul.f32 0.2, %v397_v35 }
  0xe2   : > { %v388_v37 = vpop.permute.xlu0 %387  ;;  %1279 = vmatmul.mubr.f32.vlgmr.msra.gmra.mrb[0].mxu0 %v407_v36 }
  0xe3   : > { %v396_v38 = vmul.f32 %v1130_v31, %v388_v37  ;;  %1506 = vmatpush3.bf16.msra.mxu0 %v2092_v8  ;;  %1348 = vmatprep.mubr.msk.f32.mxu0 %vm1876_vm0, %v1877_v7 }
  0xe4   : > { %1507 = vmatprep.subr.bf16.mxu0 %v1875_v1 }
  0xe5   : > { %v493_v42 = vadd.f32 %v492_v39, %v396_v38  ;;  %v2171_v43 = vadd.f32 %v578_v40, %v396_v38  ;;  %v2173_v44 = vadd.f32 %v662_v41, %v396_v38  ;;  %v2175_v45 = vadd.f32 %v397_v35, %v396_v38 }
  0xe6   : > { %v409_v47 = vadd.f32 %v408_v46, %v396_v38 }
  0xe7   : > { %1509 = vmatpush3.bf16.msra.mxu0 %v2097_v9 }
  0xe8   : > { %1510 = vmatprep.subr.bf16.mxu0 %v1875_v1 }
  0xeb   : > { %1512 = vmatpush3.bf16.msra.mxu0 %v2104_v13 }
  0xec   : > { %1513 = vmatprep.subr.bf16.mxu0 %v1875_v1 }
  0xef   : > { %1515 = vmatpush3.bf16.msra.mxu0 %v2118_v17 }
  0xf0   : > { %1516 = vmatprep.subr.bf16.mxu0 %v1875_v1 }
  0xf3   : > { %1518 = vmatpush3.bf16.msra.mxu0 %v2124_v20 }
  0xf4   : > { %1519 = vmatprep.subr.bf16.mxu0 %v1875_v1 }
  0xf7   : > { %1521 = vmatpush3.bf16.msra.mxu0 %v2130_v23 }
  0xf8   : > { %1522 = vmatprep.subr.bf16.mxu0 %v1875_v1 }
  0xfb   : > { %1524 = vmatpush3.bf16.msra.mxu0 %v2136_v26 }
  0xfc   : > { %1525 = vmatprep.subr.bf16.mxu0 %v1875_v1 }
  0xff   : > { %1527 = vmatpush3.bf16.msra.mxu0 %v2142_v29 }
 0x100   : > { %1552 = vmatprep.subr.bf16.mxu0 %v1875_v1 }
 0x1b5   : > { %v476_v48 = vpop.f32.mrb[0].mxu0 }
 0x1b6   : > { %v477_v49 = vadd.f32 %v476_v48, %v409_v47  ;;  %v1280_v50 = vpop.f32.mrb[1].mxu0 }
 0x1b8   : > { %1131 = vst [vmem:[%s2113_s21 + $0x8] sm:$0xff] %v477_v49  ;;  %v482_v52 = vmul.f32 0.225, %v477_v49  ;;  %v486_v58 = vmul.f32 -11.595794, %v477_v49 }
 0x1b9   : > { %v488_v59 = vmul.f32 -10.757576, %v477_v49  ;;  %v484_v60 = vmul.f32 -3.7333333, %v477_v49 }
 0x1ba   : > { %v483_v53 = vadd.f32 %v482_v52, %v400_v51  ;;  %v487_v2 = vadd.f32 %v486_v58, %v402_v56 }
 0x1bb   : > { %v489_v3 = vadd.f32 %v488_v59, %v403_v57  ;;  %v485_v4 = vadd.f32 %v484_v60, %v401_v61 }
 0x1bc   : > { %v490_v54 = vmul.f32 %v483_v53, %v2162_v33 }
 0x1be   : > { %v491_v55 = vadd.f32 %v490_v54, %v2160_v32 }
 0x1c0   : > { %1314 = vmatmul.mubr.f32.vlgmr.msra.gmra.mrb[0].mxu1 %v491_v55 }
 0x1c1   : > { %1530 = vmatpush3.bf16.msra.mxu1 %v2092_v8  ;;  %1383 = vmatprep.mubr.msk.f32.mxu1 %vm1876_vm0, %v1877_v7 }
 0x1c2   : > { %1531 = vmatprep.subr.bf16.mxu1 %v1875_v1 }
 0x1c5   : > { %1533 = vmatpush3.bf16.msra.mxu1 %v2097_v9 }
 0x1c6   : > { %1534 = vmatprep.subr.bf16.mxu1 %v1875_v1 }
 0x1c9   : > { %1536 = vmatpush3.bf16.msra.mxu1 %v2104_v13 }
 0x1ca   : > { %1537 = vmatprep.subr.bf16.mxu1 %v1875_v1 }
 0x1cd   : > { %1539 = vmatpush3.bf16.msra.mxu1 %v2118_v17 }
 0x1ce   : > { %1540 = vmatprep.subr.bf16.mxu1 %v1875_v1 }
 0x1d1   : > { %1542 = vmatpush3.bf16.msra.mxu1 %v2124_v20 }
 0x1d2   : > { %1543 = vmatprep.subr.bf16.mxu1 %v1875_v1 }
 0x1d5   : > { %1545 = vmatpush3.bf16.msra.mxu1 %v2130_v23 }
 0x1d6   : > { %1546 = vmatprep.subr.bf16.mxu1 %v1875_v1 }
 0x1d9   : > { %1548 = vmatpush3.bf16.msra.mxu1 %v2136_v26 }
 0x1da   : > { %1549 = vmatprep.subr.bf16.mxu1 %v1875_v1 }
 0x1dd   : > { %1551 = vmatpush3.bf16.msra.mxu1 %v2142_v29 }
 0x1de   : > { %1576 = vmatprep.subr.bf16.mxu1 %v1875_v1 }
 0x293   : > { %v560_v62 = vpop.f32.mrb[0].mxu1 }
 0x294   : > { %v561_v63 = vadd.f32 %v560_v62, %v493_v42  ;;  %v1315_v0 = vpop.f32.mrb[1].mxu1 }
 0x296   : > { %1132 = vst [vmem:[%s2113_s21 + $0x10] sm:$0xff] %v561_v63  ;;  %v566_v5 = vmul.f32 3.5555556, %v561_v63  ;;  %v568_v6 = vmul.f32 9.822893, %v561_v63 }
 0x297   : > { %v570_v10 = vmul.f32 8.906423, %v561_v63  ;;  %v572_v21 = vmul.f32 0.4492363, %v561_v63  ;;  %v574_v25 = vmul.f32 -0.0042527704, %v561_v63 }
 0x298   : > { %v567_v11 = vadd.f32 %v566_v5, %v485_v4  ;;  %v569_v12 = vadd.f32 %v568_v6, %v487_v2 }
 0x299   : > { %v571_v15 = vadd.f32 %v570_v10, %v489_v3  ;;  %v573_v34 = vadd.f32 %v572_v21, %v404_v19  ;;  %v575_v36 = vadd.f32 %v574_v25, %v405_v24 }
 0x29a   : > { %v576_v16 = vmul.f32 %v567_v11, %v2162_v33 }
 0x29c   : > { %v577_v18 = vadd.f32 %v576_v16, %v2160_v32 }
 0x29e   : > { %1349 = vmatmul.mubr.f32.vlgmr.msra.gmra.mrb[2].mxu0 %v577_v18 }
 0x29f   : > { %1554 = vmatpush3.bf16.msra.mxu0 %v2092_v8  ;;  %1418 = vmatprep.mubr.msk.f32.mxu0 %vm1876_vm0, %v1877_v7 }
 0x2a0   : > { %1555 = vmatprep.subr.bf16.mxu0 %v1875_v1 }
 0x2a3   : > { %1557 = vmatpush3.bf16.msra.mxu0 %v2097_v9 }
 0x2a4   : > { %1558 = vmatprep.subr.bf16.mxu0 %v1875_v1 }
 0x2a7   : > { %1560 = vmatpush3.bf16.msra.mxu0 %v2104_v13 }
 0x2a8   : > { %1561 = vmatprep.subr.bf16.mxu0 %v1875_v1 }
 0x2ab   : > { %1563 = vmatpush3.bf16.msra.mxu0 %v2118_v17 }
 0x2ac   : > { %1564 = vmatprep.subr.bf16.mxu0 %v1875_v1 }
 0x2af   : > { %1566 = vmatpush3.bf16.msra.mxu0 %v2124_v20 }
 0x2b0   : > { %1567 = vmatprep.subr.bf16.mxu0 %v1875_v1 }
 0x2b3   : > { %1569 = vmatpush3.bf16.msra.mxu0 %v2130_v23 }
 0x2b4   : > { %1570 = vmatprep.subr.bf16.mxu0 %v1875_v1 }
 0x2b7   : > { %1572 = vmatpush3.bf16.msra.mxu0 %v2136_v26 }
 0x2b8   : > { %1573 = vmatprep.subr.bf16.mxu0 %v1875_v1 }
 0x2bb   : > { %1575 = vmatpush3.bf16.msra.mxu0 %v2142_v29 }
 0x371   : > { %v646_v22 = vpop.f32.mrb[2].mxu0 }
 0x372   : > { %v647_v27 = vadd.f32 %v646_v22, %v2171_v43  ;;  %v1350_v28 = vpop.f32.mrb[3].mxu0 }
 0x374   : > { %1133 = vst [vmem:[%s2113_s21 + $0x18] sm:$0xff] %v647_v27  ;;  %v652_v30 = vmul.f32 -0.29080933, %v647_v27  ;;  %v654_v31 = vmul.f32 0.2784091, %v647_v27 }
 0x375   : > { %v656_v35 = vmul.f32 0.6510417, %v647_v27  ;;  %v658_v37 = vmul.f32 0.036979165, %v647_v27 }
 0x376   : > { %v653_v38 = vadd.f32 %v652_v30, %v569_v12  ;;  %v655_v39 = vadd.f32 %v654_v31, %v571_v15 }
 0x377   : > { %v657_v40 = vadd.f32 %v656_v35, %v573_v34  ;;  %v659_v41 = vadd.f32 %v658_v37, %v575_v36 }
 0x378   : > { %v660_v42 = vmul.f32 %v653_v38, %v2162_v33 }
 0x37a   : > { %v661_v46 = vadd.f32 %v660_v42, %v2160_v32 }
 0x37c   : > { %1384 = vmatmul.mubr.f32.vlgmr.msra.gmra.mrb[2].mxu1 %v661_v46 }
 0x37d   : > { %1578 = vmatpush3.bf16.msra.mxu1 %v2092_v8  ;;  %1453 = vmatprep.mubr.msk.f32.mxu1 %vm1876_vm0, %v1877_v7 }
 0x37e   : > { %1579 = vmatprep.subr.bf16.mxu1 %v1875_v1 }
 0x381   : > { %1581 = vmatpush3.bf16.msra.mxu1 %v2097_v9 }
 0x382   : > { %1582 = vmatprep.subr.bf16.mxu1 %v1875_v1 }
 0x385   : > { %1584 = vmatpush3.bf16.msra.mxu1 %v2104_v13 }
 0x386   : > { %1585 = vmatprep.subr.bf16.mxu1 %v1875_v1 }
 0x389   : > { %1587 = vmatpush3.bf16.msra.mxu1 %v2118_v17 }
 0x38a   : > { %1588 = vmatprep.subr.bf16.mxu1 %v1875_v1 }
 0x38d   : > { %1590 = vmatpush3.bf16.msra.mxu1 %v2124_v20 }
 0x38e   : > { %1591 = vmatprep.subr.bf16.mxu1 %v1875_v1 }
 0x391   : > { %1593 = vmatpush3.bf16.msra.mxu1 %v2130_v23 }
 0x392   : > { %1594 = vmatprep.subr.bf16.mxu1 %v1875_v1 }
 0x395   : > { %1596 = vmatpush3.bf16.msra.mxu1 %v2136_v26 }
 0x396   : > { %1597 = vmatprep.subr.bf16.mxu1 %v1875_v1 }
 0x399   : > { %1599 = vmatpush3.bf16.msra.mxu1 %v2142_v29 }
 0x44f   : > { %v730_v7 = vpop.f32.mrb[2].mxu1 }
 0x450   : > { %v731_v8 = vadd.f32 %v730_v7, %v2173_v44  ;;  %v1385_v9 = vpop.f32.mrb[3].mxu1 }
 0x452   : > { %1134 = vst [vmem:[%s2113_s21 + $0x20] sm:$0xff] %v731_v8  ;;  %v736_v13 = vmul.f32 -0.27353132, %v731_v8  ;;  %v738_v14 = vmul.f32 -0.3223762, %v731_v8 }
 0x453   : > { %v740_v17 = vmul.f32 -0.0508638, %v731_v8 }
 0x454   : > { %v737_v20 = vadd.f32 %v736_v13, %v655_v39  ;;  %v739_v43 = vadd.f32 %v738_v14, %v657_v40 }
 0x455   : > { %v741_v23 = vadd.f32 %v740_v17, %v659_v41 }
 0x456   : > { %v742_v47 = vmul.f32 %v737_v20, %v2162_v33 }
 0x458   : > { %v743_v1 = vadd.f32 %v742_v47, %v2160_v32 }
 0x45a   : > { %1419 = vmatmul.mubr.f32.vlgmr.msra.gmra.mrb[4].mxu0 %v743_v1 }
 0x52d   : > { %v811_v26 = vpop.f32.mrb[4].mxu0 }
 0x52e   : > { %v812_v29 = vadd.f32 %v811_v26, %v2175_v45  ;;  %v1420_v44 = vpop.f32.mrb[5].mxu0 }
 0x530   : > { %1135 = vst [vmem:[%s2113_s21 + $0x28] sm:$0xff] %v812_v29  ;;  %v817_v48 = vmul.f32 0.13095239, %v812_v29  ;;  %v819_v49 = vmul.f32 0.041904762, %v812_v29 }
 0x532   : > { %v818_v50 = vadd.f32 %v817_v48, %v739_v43  ;;  %v820_v51 = vadd.f32 %v819_v49, %v741_v23 }
 0x534   : > { %v821_v52 = vmul.f32 %v818_v50, %v2162_v33 }
 0x536   : > { %v822_v53 = vadd.f32 %v821_v52, %v2160_v32 }
 0x538   : > { %1454 = vmatmul.mubr.f32.vlgmr.msra.gmra.mrb[4].mxu1 %v822_v53  ;;  %898 = vst [vmem:[%s338_s9] sm:$0xff] %v822_v53 }
 0x539   : > { %1751 = shalt.err (!%p1748_p9)
}
 0x53a   : > { %s1752_s16 = scalar_lea.hbm %s2275_s15, 128  ;;  %s1756_s14 = scalar_lea.hbm %s2388_s5, 256 }
 0x53b   : > { %p1753_p2 = scmp.ne.s32.totalorder %s2275_s15, %s1752_s16  ;;  %p1757_p11 = scmp.lt.u32.totalorder %s2275_s15, %s2388_s5 }
 0x53c   : > { %p1758_p1 = scmp.lt.u32.totalorder %s1756_s14, %s1752_s16  ;;  %p1760_p6 = scmp.lt.u32.totalorder %s1752_s16, %s2275_s15 }
 0x53d   : > { %p1754_p5 = pnand %p1753_p2, %p2018_p12 }
 0x53e   : > { %p1759_p4 = por %p1758_p1, %p1757_p11 }
 0x53f   : > { %p1755_p0 = pneg %p1754_p5 }
 0x540   : > { %p1761_p8 = por %p1760_p6, %p1759_p4 }
 0x542   : > { %p1762_p10 = pnand %p1761_p8, %p1755_p0 }
 0x544   : > { %1765 = shalt.err (!%p1762_p10)
}
 0x545   : > { %1607 = dma.vmem_to_hbm [thread:$0]  (%p2018_p12), %s925_s10, 128, %s2275_s15, %s901_s11  }
 0x546   : > { %s949_s29 = sshll.u32 %s2113_s21, 4  ;;  %s905_s12 = sand.u32 1, %s1946_s28   ;;  %s2300_s29 = int_to_ptr.vmem [resolvable:$true] %s949_s29 }
 0x547   : > { %s345_s16 = scalar_lea.vmem [#allocation8], %s2066_s22  ;;  %s2306_s18 = scalar_lea.hbm %s2389_s6, %s2269_s30 }
 0x548   : > { %s937_s9 = sshll.u32 %s345_s16, 4  ;;  %s2312_s11 = scalar_lea.hbm %s2390_s7, %s2269_s30  ;;  %s2315_s9 = int_to_ptr.vmem [resolvable:$true] %s937_s9 }
 0x549   : > { %s2317_s28 = scalar_lea.sflag [#allocation9], %s905_s12  ;;  %s1766_s22 = scalar_lea.vmem %s2315_s9, 128 }
 0x54a   : > { %p1767_p13 = scmp.ne.s32.totalorder %s2315_s9, %s1766_s22 }
 0x54c   : > { %p1768_p3 = pnand %p1767_p13, %p2018_p12 }
 0x54e   : > { %p1769_p7 = pneg %p1768_p3 }
 0x60b   : > { %v889_v32 = vpop.f32.mrb[4].mxu1 }
 0x60c   : > { %v890_v54 = vadd.f32 %v889_v32, %v2175_v45  ;;  %v1455_v55 = vpop.f32.mrb[5].mxu1 }
 0x60e   : > { %1136 = vst [vmem:[%s2113_s21 + $0x30] sm:$0xff] %v890_v54  ;;  %v895_v56 = vmul.f32 -0.025, %v890_v54  ;;  %s1880_s21 = smov [#allocation8]  }
 0x60f   : > { %s1770_s23 = sshll.u32 %s1880_s21, 4  ;;  %s1771_s23 = int_to_ptr.vmem [resolvable:$false] %s1770_s23 }
 0x610   : > { %v896_v57 = vadd.f32 %v895_v56, %v820_v51  ;;  %s1772_s30 = scalar_lea.vmem %s1771_s23, 256  ;;  %p1773_p9 = scmp.lt.s32.totalorder %s2315_s9, %s1771_s23 }
 0x611   : > { %p1774_p2 = scmp.lt.s32.totalorder %s1772_s30, %s1766_s22 }
 0x612   : > { %v897_v45 = vmul.f32 %v896_v57, %v2162_v33 }
 0x613   : > { %p1775_p5 = por %p1774_p2, %p1773_p9 }
 0x614   : > { %899 = vst [vmem:[%s345_s16] sm:$0xff] %v897_v45 }
 0x615   : > { %p1776_p0 = pnand %p1775_p5, %p1769_p7 }
 0x617   : > { %1779 = shalt.err (!%p1776_p0)
}
 0x618   : > { %s1780_s12 = scalar_lea.hbm %s2306_s18, 128  ;;  %s1784_s14 = scalar_lea.hbm %s2389_s6, 256 }
 0x619   : > { %p1781_p11 = scmp.ne.s32.totalorder %s2306_s18, %s1780_s12  ;;  %p1785_p6 = scmp.lt.u32.totalorder %s2306_s18, %s2389_s6 }
 0x61a   : > { %p1786_p8 = scmp.lt.u32.totalorder %s1784_s14, %s1780_s12  ;;  %p1788_p13 = scmp.lt.u32.totalorder %s1780_s12, %s2306_s18 }
 0x61b   : > { %p1782_p1 = pnand %p1781_p11, %p2018_p12 }
 0x61c   : > { %p1787_p10 = por %p1786_p8, %p1785_p6 }
 0x61d   : > { %p1783_p4 = pneg %p1782_p1 }
 0x61e   : > { %p1789_p3 = por %p1788_p13, %p1787_p10 }
 0x620   : > { %p1790_p7 = pnand %p1789_p3, %p1783_p4 }
 0x622   : > { %1793 = shalt.err (!%p1790_p7)
}
 0x623   : > { %1608 = dma.vmem_to_hbm [thread:$0]  (%p2018_p12), %s2315_s9, 128, %s2306_s18, %s2317_s28  }
 0x624   : > { %s1794_s22 = scalar_lea.vmem %s2300_s29, 896  ;;  %s1881_s21 = smov [#allocation10]  }
 0x625   : > { %p1795_p9 = scmp.ne.s32.totalorder %s2300_s29, %s1794_s22  ;;  %s1798_s23 = sshll.u32 %s1881_s21, 4  ;;  %s1799_s23 = int_to_ptr.vmem [resolvable:$false] %s1798_s23 }
 0x626   : > { %s1800_s30 = scalar_lea.vmem %s1799_s23, 1792  ;;  %p1801_p0 = scmp.lt.s32.totalorder %s2300_s29, %s1799_s23 }
 0x627   : > { %p1796_p2 = pnand %p1795_p9, %p2018_p12  ;;  %p1802_p11 = scmp.lt.s32.totalorder %s1800_s30, %s1794_s22 }
 0x629   : > { %p1797_p5 = pneg %p1796_p2  ;;  %p1803_p1 = por %p1802_p11, %p1801_p0 }
 0x62b   : > { %p1804_p4 = pnand %p1803_p1, %p1797_p5 }
 0x62d   : > { %1807 = shalt.err (!%p1804_p4)
}
 0x62e   : > { %s1808_s9 = scalar_lea.hbm %s2312_s11, 896  ;;  %s1812_s16 = scalar_lea.hbm %s2390_s7, 1792 }
 0x62f   : > { %p1809_p6 = scmp.ne.s32.totalorder %s2312_s11, %s1808_s9  ;;  %p1813_p13 = scmp.lt.u32.totalorder %s2312_s11, %s2390_s7 }
 0x630   : > { %p1814_p3 = scmp.lt.u32.totalorder %s1812_s16, %s1808_s9  ;;  %p1816_p9 = scmp.lt.u32.totalorder %s1808_s9, %s2312_s11 }
 0x631   : > { %p1810_p8 = pnand %p1809_p6, %p2018_p12 }
 0x632   : > { %p1815_p7 = por %p1814_p3, %p1813_p13 }
 0x633   : > { %p1811_p10 = pneg %p1810_p8 }
 0x634   : > { %p1817_p2 = por %p1816_p9, %p1815_p7 }
 0x636   : > { %p1818_p5 = pnand %p1817_p2, %p1811_p10 }
 0x638   : > { %1821 = shalt.err (!%p1818_p5)
}
 0x639   : > { %s1882_s15 = smov 128   ;;  %s1883_s10 = smov 256  }
 0x63a   : > { %s1884_s22 = smov 8  }
 0x63b   : > { %1609 = dma.vmem_to_hbm [thread:$0]  (%p2018_p12), %s2300_s29, 896, %s2312_s11, %s2317_s28, %s1882_s15, %s1883_s10, %s1884_s22  }
 0x63c PF: > { %s964_s21 = sand.u32 1, %s1856_s24   ;;  %p2406_p0 = scmp.ne.s32.totalorder %s2396_s8, 0 }
 0x63d   : > { %p2407_p11 = scmp.ge.s32.totalorder %s1868_s27, 2  ;;  %s965_s23 = scalar_lea.sflag [#allocation4], %s964_s21 }
 0x63f   : > { %p1622_p1 = pnand %p2407_p11, %p2406_p0 }
 0x641   : > { %1847 = dma.done.wait (!%p1622_p1), %s965_s23, 128  }
 0x642   : > { %1849 = vsyncadd (!%p1622_p1), %s965_s23, 4294967168  ;;  %s2408_s30 = sadd.s32 4294967294, %s1868_s27  }
 0x643   : > { %s973_s9 = sand.u32 1, %s2408_s30  }
 0x644   : > { %s974_s18 = scalar_lea.sflag [#allocation9], %s973_s9 }
 0x645   : > { %1851 = dma.done.wait (!%p1622_p1), %s974_s18, 1024  }
 0x646   : > { %1853 = vsyncadd (!%p1622_p1), %s974_s18, 4294966272  ;;  %p25_p12 = scmp.ge.s32.totalorder %s1983_s13, 4   ;;  %s2409_s24 = smov %s1860_s25 }
 0x647   : > { %s2410_s25 = smov %s1864_s26  ;;  %s2411_s26 = smov %s2014_s19 }
 0x648   : > { %s2412_s27 = smov %s1983_s13  ;;  %27 = sbr.rel (!%p25_p12) target bundleno = 8 (0x8), region = 133 }
 0x64f   :  { %988 = vsyncpa [#allocation3], 1 }
 0x650   :  { %990 = vsyncpa [#allocation3 + $0x1], 1 }
 0x651   :  { %991 = vsyncpa [#allocation6], 1 }
 0x652   :  { %992 = vsyncpa [#allocation4], 1 }
 0x653   :  { %994 = vsyncpa [#allocation4 + $0x1], 1 }
 0x654   :  { %995 = vsyncpa [#allocation9], 1 }
 0x655   :  { %997 = vsyncpa [#allocation9 + $0x1], 1 }

// kernel: tpu_custom_call.1
= control target key start
LH: loop header
LB: loop body
LE: loop exit
PB: predicated region body
PF: predicated region fallthrough
CT: control target
= control target key end

     0   :  { %13 = vsyncpa [#allocation3], 0  ;;  %s2383_s0 = inlined_call_operand.vmem [shape: f32[16,128], index: 0, kind: input, shape index: {}]   ;;  %s2384_s1 = inlined_call_operand.hbm [shape: f32[16,128], index: 1, kind: input, shape index: {}]   ;;  %s2385_s2 = inlined_call_operand.vmem [shape: f32[16,2], index: 2, kind: input, shape index: {}]   ;;  %s2386_s3 = inlined_call_operand.hbm [shape: f32[128,128], index: 3, kind: input, shape index: {}]   ;;  %s2387_s4 = inlined_call_operand.vmem [shape: f32[1,128], index: 4, kind: input, shape index: {}]   ;;  %s2388_s5 = inlined_call_operand.hbm [shape: f32[16,128], index: 5, kind: output, shape index: {0}]   ;;  %s2389_s6 = inlined_call_operand.hbm [shape: f32[16,128], index: 6, kind: output, shape index: {1}]   ;;  %s2390_s7 = inlined_call_operand.hbm [shape: f32[7,16,128], index: 7, kind: output, shape index: {2}]  }
   0x1   :  { %15 = vsyncpa [#allocation3 + $0x1], 0 }
   0x2   :  { %16 = vsyncpa [#allocation6], 0 }
   0x3   :  { %17 = vsyncpa [#allocation4], 0 }
   0x4   :  { %19 = vsyncpa [#allocation4 + $0x1], 0 }
   0x5   :  { %20 = vsyncpa [#allocation9], 0 }
   0x6   :  { %22 = vsyncpa [#allocation9 + $0x1], 0  ;;  %s1925_s24 = smov 0   ;;  %s1927_s25 = smov 0  }
   0x7   :  { %s1929_s26 = smov 0   ;;  %s1931_s27 = smov 0  }
   0x8 LB: > { %s1946_s28 = sadd.s32 4294967295, %s1868_s27   ;;  %s2394_s29 = sadd.s32 4294967294, %s1868_s27   ;;  %s1868_s27 = sphi %s1931_s27, %s2412_s27   ;;  %s1864_s26 = sphi %s1929_s26, %s2411_s26   ;;  %s1860_s25 = sphi %s1927_s25, %s2410_s25   ;;  %s1856_s24 = sphi %s1925_s24, %s2409_s24  }
   0x9   : > { %p74_p0 = scmp.ne.s32.totalorder %s1860_s25, %s1856_s24  ;;  %p2391_p1 = scmp.eq.s32.totalorder %s1946_s28, 0 }
   0xa   : > { %p172_p3 = scmp.eq.s32.totalorder %s2394_s29, 1  ;;  %p1118_p5 = scmp.ge.s32.totalorder %s1868_s27, 1 }
   0xb   : > { %p1957_p4 = por %p2391_p1, %p74_p0  ;;  %p231_p7 = scmp.lt.s32.totalorder %s1868_s27, 3 }
   0xc   : > { %p1962_p6 = por %p172_p3, %p74_p0  ;;  %s1870_s10 = smov [#allocation5]  }
   0xd   : > { %s2395_s30 = scalar_select %p1957_p4, 1, 0 }
   0xe   : > { %s2396_s8 = scalar_select %p1962_p6, 1, 0 }
   0xf   : > { %p1967_p8 = pnand %p1118_p5, %p231_p7  ;;  %s243_s11 = sshll.u32 %s1870_s10, 4  ;;  %s1971_s11 = int_to_ptr.vmem [resolvable:$true] %s243_s11 }
  0x10   : > { %s1983_s13 = sadd.s32 1, %s1868_s27   ;;  %s61_s14 = sadd.s32 1, %s1864_s26 }
  0x11   : > { %s2397_s9 = scalar_select %p1967_p8, 1, 0 }
  0x12   : > { %p1613_p9 = pneg %p1967_p8  ;;  %s58_s15 = ssub.s32 %s1868_s27, %s1983_s13 }
  0x13   : > { %s1680_s18 = scalar_lea.hbm %s2386_s3, 2048 }
  0x14   : > { %p1978_p11 = pnand %p1613_p9, %p2391_p1  ;;  %p1681_p12 = scmp.ne.s32.totalorder %s2386_s3, %s1680_s18 }
  0x15   : > { %p1687_p5 = scmp.lt.u32.totalorder %s1680_s18, %s2386_s3 }
  0x16   : > { %p1682_p13 = pneg %p1978_p11 }
  0x18   : > { %p1683_p0 = pnand %p1682_p13, %p1681_p12 }
  0x1a   : > { %p1684_p3 = pneg %p1683_p0 }
  0x1c   : > { %p1689_p7 = pnand %p1687_p5, %p1684_p3 }
  0x1e   : > { %1692 = shalt.err (!%p1689_p7)
}
  0x1f   : > { %s1693_s23 = scalar_lea.vmem %s1971_s11, 2048  ;;  %p1701_p2 = scmp.lt.s32.totalorder %s1971_s11, %s1971_s11 }
  0x20   : > { %p1694_p9 = scmp.ne.s32.totalorder %s1971_s11, %s1693_s23  ;;  %p1702_p6 = scmp.lt.s32.totalorder %s1693_s23, %s1693_s23 }
  0x22   : > { %p1696_p10 = pnand %p1694_p9, %p1682_p13  ;;  %p1703_p4 = por %p1702_p6, %p1701_p2 }
  0x24   : > { %p1697_p1 = pneg %p1696_p10 }
  0x26   : > { %p1704_p8 = pnand %p1703_p4, %p1697_p1 }
  0x28   : > { %1707 = shalt.err (!%p1704_p8)
}
  0x29   : > { %s1871_s10 = smov 128   ;;  %s1872_s16 = smov 8  }
  0x2a   : > { %1616 = dma.hbm_to_vmem [thread:$0]  (!%p1978_p11), %s2386_s3, 2048, %s1971_s11, [#allocation6], %s1871_s10, %s1871_s10, %s1872_s16  }
  0x2b   : > { %p59_p2 = scmp.eq.s32.totalorder %s58_s15, 0  ;;  %p68_p1 = scmp.ne.s32.totalorder %s1864_s26, %s1860_s25 }
  0x2c   : > { %p69_p4 = scmp.eq.s32.totalorder %s1868_s27, 0  ;;  %p1632_p6 = scmp.lt.s32.totalorder %s1868_s27, 2 }
  0x2d   : > { %s2014_s19 = scalar_select %p59_p2, %s1864_s26, %s61_s14  }
  0x2e   : > { %p70_p8 = por %p69_p4, %p68_p1  ;;  %p2399_p10 = scmp.eq.s32.totalorder %s1946_s28, 1 }
  0x2f   : > { %s267_s21 = sand.u32 1, %s1864_s26   ;;  %s1122_s22 = sshll.u32 %s1868_s27, 7 }
  0x30   : > { %p2018_p12 = por %p2399_p10, %p68_p1  ;;  %s1121_s23 = sshll.u32 %s267_s21, 3 }
  0x31   : > { %s2027_s17 = scalar_lea.hbm %s2384_s1, %s1122_s22  ;;  %s271_s11 = scalar_lea.vmem [#allocation2], %s1121_s23 }
  0x32   : > { %s278_s14 = sshll.u32 %s271_s11, 4  ;;  %p2029_p11 = pnand %p1632_p6, %p70_p8  ;;  %s2033_s14 = int_to_ptr.vmem [resolvable:$true] %s278_s14 }
  0x33   : > { %s268_s10 = scalar_lea.sflag [#allocation3], %s267_s21  ;;  %s1708_s16 = scalar_lea.hbm %s2027_s17, 128 }
  0x34   : > { %p1709_p13 = scmp.ne.s32.totalorder %s2027_s17, %s1708_s16  ;;  %p1710_p0 = pneg %p2029_p11 }
  0x35   : > { %s1713_s22 = scalar_lea.hbm %s2384_s1, 256  ;;  %p1714_p7 = scmp.lt.u32.totalorder %s2027_s17, %s2384_s1 }
  0x36   : > { %p1711_p3 = pnand %p1710_p0, %p1709_p13  ;;  %p1715_p9 = scmp.lt.u32.totalorder %s1713_s22, %s1708_s16 }
  0x37   : > { %p1717_p1 = scmp.lt.u32.totalorder %s1708_s16, %s2027_s17 }
  0x38   : > { %p1712_p5 = pneg %p1711_p3  ;;  %p1716_p2 = por %p1715_p9, %p1714_p7 }
  0x3a   : > { %p1718_p4 = por %p1717_p1, %p1716_p2 }
  0x3c   : > { %p1719_p6 = pnand %p1718_p4, %p1712_p5 }
  0x3e   : > { %1722 = shalt.err (!%p1719_p6)
}
  0x3f   : > { %s1723_s21 = scalar_lea.vmem %s2033_s14, 128  ;;  %s1873_s11 = smov [#allocation2]  }
  0x40   : > { %p1724_p8 = scmp.ne.s32.totalorder %s2033_s14, %s1723_s21  ;;  %s1728_s29 = sshll.u32 %s1873_s11, 4  ;;  %s1729_s29 = int_to_ptr.vmem [resolvable:$false] %s1728_s29 }
  0x41   : > { %s1730_s18 = scalar_lea.vmem %s1729_s29, 256  ;;  %p1731_p3 = scmp.lt.s32.totalorder %s2033_s14, %s1729_s29 }
  0x42   : > { %p1726_p10 = pnand %p1724_p8, %p1710_p0  ;;  %p1732_p7 = scmp.lt.s32.totalorder %s1730_s18, %s1723_s21 }
  0x44   : > { %p1727_p13 = pneg %p1726_p10  ;;  %p1733_p9 = por %p1732_p7, %p1731_p3 }
  0x46   : > { %p1734_p2 = pnand %p1733_p9, %p1727_p13 }
  0x48   : > { %1737 = shalt.err (!%p1734_p2)
}
  0x49   : > { %1620 = dma.hbm_to_vmem [thread:$0]  (!%p2029_p11), %s2027_s17, 128, %s2033_s14, %s268_s10  }
  0x4a   : > { %p2402_p5 = scmp.ne.s32.totalorder %s2397_s9, 0 }
  0x4b   : > { %s2063_s16 = sand.u32 (!%p2402_p5), 1, %s1860_s25   ;;  %p2403_p0 = scmp.ne.s32.totalorder (!%p2402_p5), %s2395_s30, 0 }
  0x4c   : > { %294 = sbr.rel (%p2402_p5) target bundleno = 1596 (0x63c), region = 40  ;;  %s2066_s22 = sshll.u32 (!%p2402_p5), %s2063_s16, 3 }
  0x4d   : > { %s297_s23 = scalar_lea.sflag (!%p2402_p5), [#allocation3], %s2063_s16  ;;  %s300_s12 = scalar_lea.vmem (!%p2402_p5), [#allocation2], %s2066_s22 }
  0x53   : > { %1839 = dma.done.wait (%p2403_p0), %s297_s23, 128  }
  0x54   : > { %1841 = vsyncadd (%p2403_p0), %s297_s23, 4294967168  ;;  %p2404_p11 = scmp.eq.s32.totalorder %s1946_s28, 0 }
  0x56   : > { %1843 = dma.done.wait (%p2404_p11), [#allocation6], 2048   ;;  %p2405_p1 = pmov %p2404_p11 }
  0x57   : > { %p353_p4 = scmp.lt.s32.totalorder %s1946_s28, 1  ;;  %v1874_v0 = vmov 1   ;;  %v1875_v1 = vmov 0.0|0.0   ;;  %v364_v3 = vld [vmem:[#allocation5] sm:$0xff]  ;;  %v365_v4 = vld [vmem:[#allocation5 + $0x8] sm:$0xff]  ;;  %v366_v5 = vld [vmem:[#allocation5 + $0x10] sm:$0xff] }
  0x58   : > { %1845 = vsyncadd (%p2405_p1), [#allocation6], 4294965248  ;;  %1678 = vset.pattern.permute.xlu0 %v1874_v0  ;;  %1456 = vmatprep.subr.bf16.mxu0 %v1875_v1  ;;  %v367_v6 = vld [vmem:[#allocation5 + $0x18] sm:$0xff]  ;;  %vm1876_vm0 = vmmov 0   ;;  %v1877_v7 = vmov 0.0   ;;  %v2092_v8 = vpack.c.bf16 %v365_v4, %v364_v3  ;;  %v1878_v10 = vmov 0  }
  0x59   : > { %s2081_s9 = scalar_select %p353_p4, %s1946_s28, 1  ;;  %1480 = vmatprep.subr.bf16.mxu1 %v1875_v1  ;;  %1278 = vmatprep.mubr.msk.f32.mxu0 %vm1876_vm0, %v1877_v7  ;;  %v2097_v9 = vpack.c.bf16 %v367_v6, %v366_v5  ;;  %v368_v11 = vld [vmem:[#allocation5 + $0x20] sm:$0xff]  ;;  %v369_v12 = vld [vmem:[#allocation5 + $0x28] sm:$0xff]  ;;  %v2108_v14 = vld [vmem:[%s300_s12] sm:$0xff] }
  0x5a   : > { %1313 = vmatprep.mubr.msk.f32.mxu1 %vm1876_vm0, %v1877_v7  ;;  %1458 = vmatpush3.bf16.msra.mxu0 %v2092_v8  ;;  %s1600_s10 = smul.u32 56, %s2063_s16  ;;  %v2104_v13 = vpack.c.bf16 %v369_v12, %v368_v11  ;;  %v370_v15 = vld [vmem:[#allocation5 + $0x30] sm:$0xff]  ;;  %v371_v16 = vld [vmem:[#allocation5 + $0x38] sm:$0xff]  ;;  %v372_v18 = vld [vmem:[#allocation5 + $0x40] sm:$0xff]  ;;  %v399_v30 = vmul.f32 0.2, %v2108_v14 }
  0x5b   : > { %s1128_s30 = sshll.u32 %s2081_s9, 3  ;;  %1482 = vmatpush3.bf16.msra.mxu1 %v2092_v8  ;;  %1459 = vmatprep.subr.bf16.mxu0 %v1875_v1  ;;  %v2118_v17 = vpack.c.bf16 %v371_v16, %v370_v15  ;;  %v373_v19 = vld [vmem:[#allocation5 + $0x48] sm:$0xff]  ;;  %v374_v21 = vld [vmem:[#allocation5 + $0x50] sm:$0xff]  ;;  %v375_v22 = vld [vmem:[#allocation5 + $0x58] sm:$0xff]  ;;  %v400_v51 = vmul.f32 0.075, %v2108_v14 }
  0x5c   : > { %s360_s15 = scalar_lea.vmem %s2385_s2, %s1128_s30  ;;  %1483 = vmatprep.subr.bf16.mxu1 %v1875_v1  ;;  %s2113_s21 = scalar_lea.vmem [#allocation10], %s1600_s10  ;;  %v2124_v20 = vpack.c.bf16 %v373_v19, %v372_v18  ;;  %v2130_v23 = vpack.c.bf16 %v375_v22, %v374_v21  ;;  %v376_v24 = vld [vmem:[#allocation5 + $0x60] sm:$0xff]  ;;  %v377_v25 = vld [vmem:[#allocation5 + $0x68] sm:$0xff]  ;;  %v378_v27 = vld [vmem:[#allocation5 + $0x70] sm:$0xff]  ;;  %v402_v56 = vmul.f32 2.9525986, %v2108_v14 }
  0x5d   : > { %v363_v2 = vld [vmem:[%s360_s15] sm:$0xff]  ;;  %398 = vst [vmem:[%s2113_s21] sm:$0xff] %v2108_v14  ;;  %v2136_v26 = vpack.c.bf16 %v377_v25, %v376_v24  ;;  %v379_v28 = vld [vmem:[#allocation5 + $0x78] sm:$0xff]  ;;  %s356_s18 = scalar_lea.vmem %s2383_s0, %s1128_s30  ;;  %v403_v57 = vmul.f32 2.8462753, %v2108_v14  ;;  %v401_v61 = vmul.f32 0.9777778, %v2108_v14 }
  0x5e   : > { %383 = vperm.xlu0 %1678, %v363_v2   ;;  %1461 = vmatpush3.bf16.msra.mxu0 %v2097_v9  ;;  %v2142_v29 = vpack.c.bf16 %v379_v28, %v378_v27  ;;  %v1130_v31 = vld [vmem:[%s2387_s4] ss:$0 sm:$0xff]  ;;  %v404_v19 = vmul.f32 0.091145836, %v2108_v14  ;;  %v405_v24 = vmul.f32 0.0012326388, %v2108_v14 }
  0x5f   : > { %1485 = vmatpush3.bf16.msra.mxu1 %v2097_v9  ;;  %1462 = vmatprep.subr.bf16.mxu0 %v1875_v1  ;;  %v2160_v32 = vld [vmem:[%s356_s18] sm:$0xff]  ;;  %s338_s9 = scalar_lea.vmem [#allocation7], %s2066_s22  ;;  %s2269_s30 = sshll.u32 %s1946_s28, 7 }
  0x60   : > { %1486 = vmatprep.subr.bf16.mxu1 %v1875_v1  ;;  %s2275_s15 = scalar_lea.hbm %s2388_s5, %s2269_s30  ;;  %s924_s10 = sshll.u32 %s338_s9, 4  ;;  %s925_s10 = int_to_ptr.vmem [resolvable:$true] %s924_s10 }
  0x61   : > { %s901_s11 = scalar_lea.sflag [#allocation4], %s2063_s16  ;;  %s1738_s29 = scalar_lea.vmem %s925_s10, 128 }
  0x62   : > { %1679 = vset.pattern.permute.xlu0 %v1878_v10  ;;  %1464 = vmatpush3.bf16.msra.mxu0 %v2104_v13  ;;  %p1739_p6 = scmp.ne.s32.totalorder %s925_s10, %s1738_s29  ;;  %s1879_s18 = smov [#allocation7]  }
  0x63   : > { %387 = vperm.xlu0 %1679, %v363_v2   ;;  %1488 = vmatpush3.bf16.msra.mxu1 %v2104_v13  ;;  %s1742_s23 = sshll.u32 %s1879_s18, 4  ;;  %s1743_s23 = int_to_ptr.vmem [resolvable:$false] %s1742_s23 }
  0x64   : > { %1465 = vmatprep.subr.bf16.mxu0 %v1875_v1  ;;  %1489 = vmatprep.subr.bf16.mxu1 %v1875_v1  ;;  %p1740_p8 = pnand %p1739_p6, %p2018_p12  ;;  %s1744_s12 = scalar_lea.vmem %s1743_s23, 256 }
  0x65   : > { %p1745_p13 = scmp.lt.s32.totalorder %s925_s10, %s1743_s23  ;;  %p1746_p3 = scmp.lt.s32.totalorder %s1744_s12, %s1738_s29 }
  0x66   : > { %1467 = vmatpush3.bf16.msra.mxu0 %v2118_v17  ;;  %p1741_p10 = pneg %p1740_p8 }
  0x67   : > { %1491 = vmatpush3.bf16.msra.mxu1 %v2118_v17  ;;  %1468 = vmatprep.subr.bf16.mxu0 %v1875_v1  ;;  %p1747_p7 = por %p1746_p3, %p1745_p13 }
  0x68   : > { %1492 = vmatprep.subr.bf16.mxu1 %v1875_v1 }
  0x69   : > { %p1748_p9 = pnand %p1747_p7, %p1741_p10 }
  0x6a   : > { %1470 = vmatpush3.bf16.msra.mxu0 %v2124_v20 }
  0x6b   : > { %1494 = vmatpush3.bf16.msra.mxu1 %v2124_v20  ;;  %1471 = vmatprep.subr.bf16.mxu0 %v1875_v1 }
  0x6c   : > { %1495 = vmatprep.subr.bf16.mxu1 %v1875_v1 }
  0x6e   : > { %1473 = vmatpush3.bf16.msra.mxu0 %v2130_v23 }
  0x6f   : > { %1497 = vmatpush3.bf16.msra.mxu1 %v2130_v23  ;;  %1474 = vmatprep.subr.bf16.mxu0 %v1875_v1 }
  0x70   : > { %1498 = vmatprep.subr.bf16.mxu1 %v1875_v1 }
  0x72   : > { %1476 = vmatpush3.bf16.msra.mxu0 %v2136_v26 }
  0x73   : > { %1500 = vmatpush3.bf16.msra.mxu1 %v2136_v26  ;;  %1477 = vmatprep.subr.bf16.mxu0 %v1875_v1 }
  0x74   : > { %1501 = vmatprep.subr.bf16.mxu1 %v1875_v1 }
  0x76   : > { %1479 = vmatpush3.bf16.msra.mxu0 %v2142_v29 }
  0x77   : > { %1503 = vmatpush3.bf16.msra.mxu1 %v2142_v29  ;;  %1504 = vmatprep.subr.bf16.mxu0 %v1875_v1 }
  0x78   : > { %1528 = vmatprep.subr.bf16.mxu1 %v1875_v1 }
  0xdd   : > { %v2162_v33 = vpop.permute.xlu0 %383 }
  0xde   : > { %v406_v34 = vmul.f32 %v399_v30, %v2162_v33  ;;  %v397_v35 = vmul.f32 %v1130_v31, %v2162_v33 }
  0xe0   : > { %v407_v36 = vadd.f32 %v406_v34, %v2160_v32  ;;  %v492_v39 = vmul.f32 0.3, %v397_v35  ;;  %v578_v40 = vmul.f32 0.8, %v397_v35  ;;  %v662_v41 = vmul.f32 0.8888889, %v397_v35 }
  0xe1   : > { %v408_v46 = vmul.f32 0.2, %v397_v35 }
  0xe2   : > { %v388_v37 = vpop.permute.xlu0 %387  ;;  %1279 = vmatmul.mubr.f32.vlgmr.msra.gmra.mrb[0].mxu0 %v407_v36 }
  0xe3   : > { %v396_v38 = vmul.f32 %v1130_v31, %v388_v37  ;;  %1506 = vmatpush3.bf16.msra.mxu0 %v2092_v8  ;;  %1348 = vmatprep.mubr.msk.f32.mxu0 %vm1876_vm0, %v1877_v7 }
  0xe4   : > { %1507 = vmatprep.subr.bf16.mxu0 %v1875_v1 }
  0xe5   : > { %v493_v42 = vadd.f32 %v492_v39, %v396_v38  ;;  %v2171_v43 = vadd.f32 %v578_v40, %v396_v38  ;;  %v2173_v44 = vadd.f32 %v662_v41, %v396_v38  ;;  %v2175_v45 = vadd.f32 %v397_v35, %v396_v38 }
  0xe6   : > { %v409_v47 = vadd.f32 %v408_v46, %v396_v38 }
  0xe7   : > { %1509 = vmatpush3.bf16.msra.mxu0 %v2097_v9 }
  0xe8   : > { %1510 = vmatprep.subr.bf16.mxu0 %v1875_v1 }
  0xeb   : > { %1512 = vmatpush3.bf16.msra.mxu0 %v2104_v13 }
  0xec   : > { %1513 = vmatprep.subr.bf16.mxu0 %v1875_v1 }
  0xef   : > { %1515 = vmatpush3.bf16.msra.mxu0 %v2118_v17 }
  0xf0   : > { %1516 = vmatprep.subr.bf16.mxu0 %v1875_v1 }
  0xf3   : > { %1518 = vmatpush3.bf16.msra.mxu0 %v2124_v20 }
  0xf4   : > { %1519 = vmatprep.subr.bf16.mxu0 %v1875_v1 }
  0xf7   : > { %1521 = vmatpush3.bf16.msra.mxu0 %v2130_v23 }
  0xf8   : > { %1522 = vmatprep.subr.bf16.mxu0 %v1875_v1 }
  0xfb   : > { %1524 = vmatpush3.bf16.msra.mxu0 %v2136_v26 }
  0xfc   : > { %1525 = vmatprep.subr.bf16.mxu0 %v1875_v1 }
  0xff   : > { %1527 = vmatpush3.bf16.msra.mxu0 %v2142_v29 }
 0x100   : > { %1552 = vmatprep.subr.bf16.mxu0 %v1875_v1 }
 0x1b5   : > { %v476_v48 = vpop.f32.mrb[0].mxu0 }
 0x1b6   : > { %v477_v49 = vadd.f32 %v476_v48, %v409_v47  ;;  %v1280_v50 = vpop.f32.mrb[1].mxu0 }
 0x1b8   : > { %1131 = vst [vmem:[%s2113_s21 + $0x8] sm:$0xff] %v477_v49  ;;  %v482_v52 = vmul.f32 0.225, %v477_v49  ;;  %v486_v58 = vmul.f32 -11.595794, %v477_v49 }
 0x1b9   : > { %v488_v59 = vmul.f32 -10.757576, %v477_v49  ;;  %v484_v60 = vmul.f32 -3.7333333, %v477_v49 }
 0x1ba   : > { %v483_v53 = vadd.f32 %v482_v52, %v400_v51  ;;  %v487_v2 = vadd.f32 %v486_v58, %v402_v56 }
 0x1bb   : > { %v489_v3 = vadd.f32 %v488_v59, %v403_v57  ;;  %v485_v4 = vadd.f32 %v484_v60, %v401_v61 }
 0x1bc   : > { %v490_v54 = vmul.f32 %v483_v53, %v2162_v33 }
 0x1be   : > { %v491_v55 = vadd.f32 %v490_v54, %v2160_v32 }
 0x1c0   : > { %1314 = vmatmul.mubr.f32.vlgmr.msra.gmra.mrb[0].mxu1 %v491_v55 }
 0x1c1   : > { %1530 = vmatpush3.bf16.msra.mxu1 %v2092_v8  ;;  %1383 = vmatprep.mubr.msk.f32.mxu1 %vm1876_vm0, %v1877_v7 }
 0x1c2   : > { %1531 = vmatprep.subr.bf16.mxu1 %v1875_v1 }
 0x1c5   : > { %1533 = vmatpush3.bf16.msra.mxu1 %v2097_v9 }
 0x1c6   : > { %1534 = vmatprep.subr.bf16.mxu1 %v1875_v1 }
 0x1c9   : > { %1536 = vmatpush3.bf16.msra.mxu1 %v2104_v13 }
 0x1ca   : > { %1537 = vmatprep.subr.bf16.mxu1 %v1875_v1 }
 0x1cd   : > { %1539 = vmatpush3.bf16.msra.mxu1 %v2118_v17 }
 0x1ce   : > { %1540 = vmatprep.subr.bf16.mxu1 %v1875_v1 }
 0x1d1   : > { %1542 = vmatpush3.bf16.msra.mxu1 %v2124_v20 }
 0x1d2   : > { %1543 = vmatprep.subr.bf16.mxu1 %v1875_v1 }
 0x1d5   : > { %1545 = vmatpush3.bf16.msra.mxu1 %v2130_v23 }
 0x1d6   : > { %1546 = vmatprep.subr.bf16.mxu1 %v1875_v1 }
 0x1d9   : > { %1548 = vmatpush3.bf16.msra.mxu1 %v2136_v26 }
 0x1da   : > { %1549 = vmatprep.subr.bf16.mxu1 %v1875_v1 }
 0x1dd   : > { %1551 = vmatpush3.bf16.msra.mxu1 %v2142_v29 }
 0x1de   : > { %1576 = vmatprep.subr.bf16.mxu1 %v1875_v1 }
 0x293   : > { %v560_v62 = vpop.f32.mrb[0].mxu1 }
 0x294   : > { %v561_v63 = vadd.f32 %v560_v62, %v493_v42  ;;  %v1315_v0 = vpop.f32.mrb[1].mxu1 }
 0x296   : > { %1132 = vst [vmem:[%s2113_s21 + $0x10] sm:$0xff] %v561_v63  ;;  %v566_v5 = vmul.f32 3.5555556, %v561_v63  ;;  %v568_v6 = vmul.f32 9.822893, %v561_v63 }
 0x297   : > { %v570_v10 = vmul.f32 8.906423, %v561_v63  ;;  %v572_v21 = vmul.f32 0.4492363, %v561_v63  ;;  %v574_v25 = vmul.f32 -0.0042527704, %v561_v63 }
 0x298   : > { %v567_v11 = vadd.f32 %v566_v5, %v485_v4  ;;  %v569_v12 = vadd.f32 %v568_v6, %v487_v2 }
 0x299   : > { %v571_v15 = vadd.f32 %v570_v10, %v489_v3  ;;  %v573_v34 = vadd.f32 %v572_v21, %v404_v19  ;;  %v575_v36 = vadd.f32 %v574_v25, %v405_v24 }
 0x29a   : > { %v576_v16 = vmul.f32 %v567_v11, %v2162_v33 }
 0x29c   : > { %v577_v18 = vadd.f32 %v576_v16, %v2160_v32 }
 0x29e   : > { %1349 = vmatmul.mubr.f32.vlgmr.msra.gmra.mrb[2].mxu0 %v577_v18 }
 0x29f   : > { %1554 = vmatpush3.bf16.msra.mxu0 %v2092_v8  ;;  %1418 = vmatprep.mubr.msk.f32.mxu0 %vm1876_vm0, %v1877_v7 }
 0x2a0   : > { %1555 = vmatprep.subr.bf16.mxu0 %v1875_v1 }
 0x2a3   : > { %1557 = vmatpush3.bf16.msra.mxu0 %v2097_v9 }
 0x2a4   : > { %1558 = vmatprep.subr.bf16.mxu0 %v1875_v1 }
 0x2a7   : > { %1560 = vmatpush3.bf16.msra.mxu0 %v2104_v13 }
 0x2a8   : > { %1561 = vmatprep.subr.bf16.mxu0 %v1875_v1 }
 0x2ab   : > { %1563 = vmatpush3.bf16.msra.mxu0 %v2118_v17 }
 0x2ac   : > { %1564 = vmatprep.subr.bf16.mxu0 %v1875_v1 }
 0x2af   : > { %1566 = vmatpush3.bf16.msra.mxu0 %v2124_v20 }
 0x2b0   : > { %1567 = vmatprep.subr.bf16.mxu0 %v1875_v1 }
 0x2b3   : > { %1569 = vmatpush3.bf16.msra.mxu0 %v2130_v23 }
 0x2b4   : > { %1570 = vmatprep.subr.bf16.mxu0 %v1875_v1 }
 0x2b7   : > { %1572 = vmatpush3.bf16.msra.mxu0 %v2136_v26 }
 0x2b8   : > { %1573 = vmatprep.subr.bf16.mxu0 %v1875_v1 }
 0x2bb   : > { %1575 = vmatpush3.bf16.msra.mxu0 %v2142_v29 }
 0x371   : > { %v646_v22 = vpop.f32.mrb[2].mxu0 }
 0x372   : > { %v647_v27 = vadd.f32 %v646_v22, %v2171_v43  ;;  %v1350_v28 = vpop.f32.mrb[3].mxu0 }
 0x374   : > { %1133 = vst [vmem:[%s2113_s21 + $0x18] sm:$0xff] %v647_v27  ;;  %v652_v30 = vmul.f32 -0.29080933, %v647_v27  ;;  %v654_v31 = vmul.f32 0.2784091, %v647_v27 }
 0x375   : > { %v656_v35 = vmul.f32 0.6510417, %v647_v27  ;;  %v658_v37 = vmul.f32 0.036979165, %v647_v27 }
 0x376   : > { %v653_v38 = vadd.f32 %v652_v30, %v569_v12  ;;  %v655_v39 = vadd.f32 %v654_v31, %v571_v15 }
 0x377   : > { %v657_v40 = vadd.f32 %v656_v35, %v573_v34  ;;  %v659_v41 = vadd.f32 %v658_v37, %v575_v36 }
 0x378   : > { %v660_v42 = vmul.f32 %v653_v38, %v2162_v33 }
 0x37a   : > { %v661_v46 = vadd.f32 %v660_v42, %v2160_v32 }
 0x37c   : > { %1384 = vmatmul.mubr.f32.vlgmr.msra.gmra.mrb[2].mxu1 %v661_v46 }
 0x37d   : > { %1578 = vmatpush3.bf16.msra.mxu1 %v2092_v8  ;;  %1453 = vmatprep.mubr.msk.f32.mxu1 %vm1876_vm0, %v1877_v7 }
 0x37e   : > { %1579 = vmatprep.subr.bf16.mxu1 %v1875_v1 }
 0x381   : > { %1581 = vmatpush3.bf16.msra.mxu1 %v2097_v9 }
 0x382   : > { %1582 = vmatprep.subr.bf16.mxu1 %v1875_v1 }
 0x385   : > { %1584 = vmatpush3.bf16.msra.mxu1 %v2104_v13 }
 0x386   : > { %1585 = vmatprep.subr.bf16.mxu1 %v1875_v1 }
 0x389   : > { %1587 = vmatpush3.bf16.msra.mxu1 %v2118_v17 }
 0x38a   : > { %1588 = vmatprep.subr.bf16.mxu1 %v1875_v1 }
 0x38d   : > { %1590 = vmatpush3.bf16.msra.mxu1 %v2124_v20 }
 0x38e   : > { %1591 = vmatprep.subr.bf16.mxu1 %v1875_v1 }
 0x391   : > { %1593 = vmatpush3.bf16.msra.mxu1 %v2130_v23 }
 0x392   : > { %1594 = vmatprep.subr.bf16.mxu1 %v1875_v1 }
 0x395   : > { %1596 = vmatpush3.bf16.msra.mxu1 %v2136_v26 }
 0x396   : > { %1597 = vmatprep.subr.bf16.mxu1 %v1875_v1 }
 0x399   : > { %1599 = vmatpush3.bf16.msra.mxu1 %v2142_v29 }
 0x44f   : > { %v730_v7 = vpop.f32.mrb[2].mxu1 }
 0x450   : > { %v731_v8 = vadd.f32 %v730_v7, %v2173_v44  ;;  %v1385_v9 = vpop.f32.mrb[3].mxu1 }
 0x452   : > { %1134 = vst [vmem:[%s2113_s21 + $0x20] sm:$0xff] %v731_v8  ;;  %v736_v13 = vmul.f32 -0.27353132, %v731_v8  ;;  %v738_v14 = vmul.f32 -0.3223762, %v731_v8 }
 0x453   : > { %v740_v17 = vmul.f32 -0.0508638, %v731_v8 }
 0x454   : > { %v737_v20 = vadd.f32 %v736_v13, %v655_v39  ;;  %v739_v43 = vadd.f32 %v738_v14, %v657_v40 }
 0x455   : > { %v741_v23 = vadd.f32 %v740_v17, %v659_v41 }
 0x456   : > { %v742_v47 = vmul.f32 %v737_v20, %v2162_v33 }
 0x458   : > { %v743_v1 = vadd.f32 %v742_v47, %v2160_v32 }
 0x45a   : > { %1419 = vmatmul.mubr.f32.vlgmr.msra.gmra.mrb[4].mxu0 %v743_v1 }
 0x52d   : > { %v811_v26 = vpop.f32.mrb[4].mxu0 }
 0x52e   : > { %v812_v29 = vadd.f32 %v811_v26, %v2175_v45  ;;  %v1420_v44 = vpop.f32.mrb[5].mxu0 }
 0x530   : > { %1135 = vst [vmem:[%s2113_s21 + $0x28] sm:$0xff] %v812_v29  ;;  %v817_v48 = vmul.f32 0.13095239, %v812_v29  ;;  %v819_v49 = vmul.f32 0.041904762, %v812_v29 }
 0x532   : > { %v818_v50 = vadd.f32 %v817_v48, %v739_v43  ;;  %v820_v51 = vadd.f32 %v819_v49, %v741_v23 }
 0x534   : > { %v821_v52 = vmul.f32 %v818_v50, %v2162_v33 }
 0x536   : > { %v822_v53 = vadd.f32 %v821_v52, %v2160_v32 }
 0x538   : > { %1454 = vmatmul.mubr.f32.vlgmr.msra.gmra.mrb[4].mxu1 %v822_v53  ;;  %898 = vst [vmem:[%s338_s9] sm:$0xff] %v822_v53 }
 0x539   : > { %1751 = shalt.err (!%p1748_p9)
}
 0x53a   : > { %s1752_s16 = scalar_lea.hbm %s2275_s15, 128  ;;  %s1756_s14 = scalar_lea.hbm %s2388_s5, 256 }
 0x53b   : > { %p1753_p2 = scmp.ne.s32.totalorder %s2275_s15, %s1752_s16  ;;  %p1757_p11 = scmp.lt.u32.totalorder %s2275_s15, %s2388_s5 }
 0x53c   : > { %p1758_p1 = scmp.lt.u32.totalorder %s1756_s14, %s1752_s16  ;;  %p1760_p6 = scmp.lt.u32.totalorder %s1752_s16, %s2275_s15 }
 0x53d   : > { %p1754_p5 = pnand %p1753_p2, %p2018_p12 }
 0x53e   : > { %p1759_p4 = por %p1758_p1, %p1757_p11 }
 0x53f   : > { %p1755_p0 = pneg %p1754_p5 }
 0x540   : > { %p1761_p8 = por %p1760_p6, %p1759_p4 }
 0x542   : > { %p1762_p10 = pnand %p1761_p8, %p1755_p0 }
 0x544   : > { %1765 = shalt.err (!%p1762_p10)
}
 0x545   : > { %1607 = dma.vmem_to_hbm [thread:$0]  (%p2018_p12), %s925_s10, 128, %s2275_s15, %s901_s11  }
 0x546   : > { %s949_s29 = sshll.u32 %s2113_s21, 4  ;;  %s905_s12 = sand.u32 1, %s1946_s28   ;;  %s2300_s29 = int_to_ptr.vmem [resolvable:$true] %s949_s29 }
 0x547   : > { %s345_s16 = scalar_lea.vmem [#allocation8], %s2066_s22  ;;  %s2306_s18 = scalar_lea.hbm %s2389_s6, %s2269_s30 }
 0x548   : > { %s937_s9 = sshll.u32 %s345_s16, 4  ;;  %s2312_s11 = scalar_lea.hbm %s2390_s7, %s2269_s30  ;;  %s2315_s9 = int_to_ptr.vmem [resolvable:$true] %s937_s9 }
 0x549   : > { %s2317_s28 = scalar_lea.sflag [#allocation9], %s905_s12  ;;  %s1766_s22 = scalar_lea.vmem %s2315_s9, 128 }
 0x54a   : > { %p1767_p13 = scmp.ne.s32.totalorder %s2315_s9, %s1766_s22 }
 0x54c   : > { %p1768_p3 = pnand %p1767_p13, %p2018_p12 }
 0x54e   : > { %p1769_p7 = pneg %p1768_p3 }
 0x60b   : > { %v889_v32 = vpop.f32.mrb[4].mxu1 }
 0x60c   : > { %v890_v54 = vadd.f32 %v889_v32, %v2175_v45  ;;  %v1455_v55 = vpop.f32.mrb[5].mxu1 }
 0x60e   : > { %1136 = vst [vmem:[%s2113_s21 + $0x30] sm:$0xff] %v890_v54  ;;  %v895_v56 = vmul.f32 -0.025, %v890_v54  ;;  %s1880_s21 = smov [#allocation8]  }
 0x60f   : > { %s1770_s23 = sshll.u32 %s1880_s21, 4  ;;  %s1771_s23 = int_to_ptr.vmem [resolvable:$false] %s1770_s23 }
 0x610   : > { %v896_v57 = vadd.f32 %v895_v56, %v820_v51  ;;  %s1772_s30 = scalar_lea.vmem %s1771_s23, 256  ;;  %p1773_p9 = scmp.lt.s32.totalorder %s2315_s9, %s1771_s23 }
 0x611   : > { %p1774_p2 = scmp.lt.s32.totalorder %s1772_s30, %s1766_s22 }
 0x612   : > { %v897_v45 = vmul.f32 %v896_v57, %v2162_v33 }
 0x613   : > { %p1775_p5 = por %p1774_p2, %p1773_p9 }
 0x614   : > { %899 = vst [vmem:[%s345_s16] sm:$0xff] %v897_v45 }
 0x615   : > { %p1776_p0 = pnand %p1775_p5, %p1769_p7 }
 0x617   : > { %1779 = shalt.err (!%p1776_p0)
}
 0x618   : > { %s1780_s12 = scalar_lea.hbm %s2306_s18, 128  ;;  %s1784_s14 = scalar_lea.hbm %s2389_s6, 256 }
 0x619   : > { %p1781_p11 = scmp.ne.s32.totalorder %s2306_s18, %s1780_s12  ;;  %p1785_p6 = scmp.lt.u32.totalorder %s2306_s18, %s2389_s6 }
 0x61a   : > { %p1786_p8 = scmp.lt.u32.totalorder %s1784_s14, %s1780_s12  ;;  %p1788_p13 = scmp.lt.u32.totalorder %s1780_s12, %s2306_s18 }
 0x61b   : > { %p1782_p1 = pnand %p1781_p11, %p2018_p12 }
 0x61c   : > { %p1787_p10 = por %p1786_p8, %p1785_p6 }
 0x61d   : > { %p1783_p4 = pneg %p1782_p1 }
 0x61e   : > { %p1789_p3 = por %p1788_p13, %p1787_p10 }
 0x620   : > { %p1790_p7 = pnand %p1789_p3, %p1783_p4 }
 0x622   : > { %1793 = shalt.err (!%p1790_p7)
}
 0x623   : > { %1608 = dma.vmem_to_hbm [thread:$0]  (%p2018_p12), %s2315_s9, 128, %s2306_s18, %s2317_s28  }
 0x624   : > { %s1794_s22 = scalar_lea.vmem %s2300_s29, 896  ;;  %s1881_s21 = smov [#allocation10]  }
 0x625   : > { %p1795_p9 = scmp.ne.s32.totalorder %s2300_s29, %s1794_s22  ;;  %s1798_s23 = sshll.u32 %s1881_s21, 4  ;;  %s1799_s23 = int_to_ptr.vmem [resolvable:$false] %s1798_s23 }
 0x626   : > { %s1800_s30 = scalar_lea.vmem %s1799_s23, 1792  ;;  %p1801_p0 = scmp.lt.s32.totalorder %s2300_s29, %s1799_s23 }
 0x627   : > { %p1796_p2 = pnand %p1795_p9, %p2018_p12  ;;  %p1802_p11 = scmp.lt.s32.totalorder %s1800_s30, %s1794_s22 }
 0x629   : > { %p1797_p5 = pneg %p1796_p2  ;;  %p1803_p1 = por %p1802_p11, %p1801_p0 }
 0x62b   : > { %p1804_p4 = pnand %p1803_p1, %p1797_p5 }
 0x62d   : > { %1807 = shalt.err (!%p1804_p4)
}
 0x62e   : > { %s1808_s9 = scalar_lea.hbm %s2312_s11, 896  ;;  %s1812_s16 = scalar_lea.hbm %s2390_s7, 1792 }
 0x62f   : > { %p1809_p6 = scmp.ne.s32.totalorder %s2312_s11, %s1808_s9  ;;  %p1813_p13 = scmp.lt.u32.totalorder %s2312_s11, %s2390_s7 }
 0x630   : > { %p1814_p3 = scmp.lt.u32.totalorder %s1812_s16, %s1808_s9  ;;  %p1816_p9 = scmp.lt.u32.totalorder %s1808_s9, %s2312_s11 }
 0x631   : > { %p1810_p8 = pnand %p1809_p6, %p2018_p12 }
 0x632   : > { %p1815_p7 = por %p1814_p3, %p1813_p13 }
 0x633   : > { %p1811_p10 = pneg %p1810_p8 }
 0x634   : > { %p1817_p2 = por %p1816_p9, %p1815_p7 }
 0x636   : > { %p1818_p5 = pnand %p1817_p2, %p1811_p10 }
 0x638   : > { %1821 = shalt.err (!%p1818_p5)
}
 0x639   : > { %s1882_s15 = smov 128   ;;  %s1883_s10 = smov 256  }
 0x63a   : > { %s1884_s22 = smov 8  }
 0x63b   : > { %1609 = dma.vmem_to_hbm [thread:$0]  (%p2018_p12), %s2300_s29, 896, %s2312_s11, %s2317_s28, %s1882_s15, %s1883_s10, %s1884_s22  }
 0x63c PF: > { %s964_s21 = sand.u32 1, %s1856_s24   ;;  %p2406_p0 = scmp.ne.s32.totalorder %s2396_s8, 0 }
 0x63d   : > { %p2407_p11 = scmp.ge.s32.totalorder %s1868_s27, 2  ;;  %s965_s23 = scalar_lea.sflag [#allocation4], %s964_s21 }
 0x63f   : > { %p1622_p1 = pnand %p2407_p11, %p2406_p0 }
 0x641   : > { %1847 = dma.done.wait (!%p1622_p1), %s965_s23, 128  }
 0x642   : > { %1849 = vsyncadd (!%p1622_p1), %s965_s23, 4294967168  ;;  %s2408_s30 = sadd.s32 4294967294, %s1868_s27  }
 0x643   : > { %s973_s9 = sand.u32 1, %s2408_s30  }
 0x644   : > { %s974_s18 = scalar_lea.sflag [#allocation9], %s973_s9 }
 0x645   : > { %1851 = dma.done.wait (!%p1622_p1), %s974_s18, 1024  }
 0x646   : > { %1853 = vsyncadd (!%p1622_p1), %s974_s18, 4294966272  ;;  %p25_p12 = scmp.ge.s32.totalorder %s1983_s13, 4   ;;  %s2409_s24 = smov %s1860_s25 }
 0x647   : > { %s2410_s25 = smov %s1864_s26  ;;  %s2411_s26 = smov %s2014_s19 }
 0x648   : > { %s2412_s27 = smov %s1983_s13  ;;  %27 = sbr.rel (!%p25_p12) target bundleno = 8 (0x8), region = 133 }
 0x64f   :  { %988 = vsyncpa [#allocation3], 1 }
 0x650   :  { %990 = vsyncpa [#allocation3 + $0x1], 1 }
 0x651   :  { %991 = vsyncpa [#allocation6], 1 }
 0x652   :  { %992 = vsyncpa [#allocation4], 1 }
 0x653   :  { %994 = vsyncpa [#allocation4 + $0x1], 1 }
 0x654   :  { %995 = vsyncpa [#allocation9], 1 }
 0x655   :  { %997 = vsyncpa [#allocation9 + $0x1], 1 }

</bundles_post_ra>
